<compile_context>
chip_gen: v7x
topology: tpu7x:2x2x1
jax: 0.10.0
libtpu: 0.0.40
codegen_flags: <defaults>
</compile_context>

<pallas_src>
import math
import functools

import jax
import jax.numpy as jnp
from jax import lax
from jax.experimental import pallas as pl
from jax.experimental.pallas import tpu as pltpu


def _layernorm(v, alpha, beta, eps=1e-6):
    # Matches LayerNormalisation: mean / torch.std (unbiased, ddof=1) over last
    # dim, scalar alpha/beta, eps added to std (not to variance).
    n = v.shape[-1]
    mean = jnp.mean(v, axis=-1, keepdims=True)
    c = v - mean
    var = jnp.sum(c * c, axis=-1, keepdims=True) * (1.0 / (n - 1))
    inv = pl.reciprocal(jnp.sqrt(var) + eps, approx=True)   # EUP slot, frees VALU
    return alpha * (c * inv) + beta


def _encoder_block_kernel(
    x_ref, mask_ref,
    wqkv_ref, bqkv_ref, wo_ref, bo_ref,
    ln1_a_ref, ln1_b_ref,
    w1_ref, b1_ref, w2_ref, b2_ref,
    ln2_a_ref, ln2_b_ref,
    o_ref,
    ctx_ref,                      # VMEM scratch (S, D) bf16 — replaces jnp.concatenate
    *, num_heads: int,
):
    x = x_ref[...]                # (S, D) f32 (leading batch dim squeezed away)
    S, D = x.shape
    H = num_heads
    dk = D // H
    scale = 1.0 / math.sqrt(dk)

    # Hoisted mask compare: one VPU pass, reused by every head.
    masked = mask_ref[...] == 0.0                   # (S, S) bool

    # ---- residual 0: self-attention on pre-normed input --------------------
    xn = _layernorm(x, ln1_a_ref[...], ln1_b_ref[...])

    # Fused QKV projection: single MXU call with N = 3*D (bf16 in, f32 acc).
    qkv = jnp.dot(xn.astype(jnp.bfloat16), wqkv_ref[...],
                  preferred_element_type=jnp.float32) + bqkv_ref[...]
    qkv_bf = qkv.astype(jnp.bfloat16)               # one cast pass over (S, 3D)

    nt_dims = (((1,), (1,)), ((), ()))              # q @ k^T without an XLU transpose
    for h in range(H):                              # static unroll over heads
        qh = qkv_bf[:, h * dk:(h + 1) * dk]
        kh = qkv_bf[:, D + h * dk:D + (h + 1) * dk]
        vh = qkv_bf[:, 2 * D + h * dk:2 * D + (h + 1) * dk]

        s = lax.dot_general(qh, kh, nt_dims,
                            preferred_element_type=jnp.float32) * scale
        s = jnp.where(masked, -1e9, s)              # mask + softmax kept in f32
        s = s - jnp.max(s, axis=-1, keepdims=True)
        p = jnp.exp(s)
        p = p * pl.reciprocal(jnp.sum(p, axis=-1, keepdims=True), approx=True)

        ctxh = jnp.dot(p.astype(jnp.bfloat16), vh,
                       preferred_element_type=jnp.float32)
        # Write head output straight into the shared (S, D) buffer (no concat).
        ctx_ref[:, h * dk:(h + 1) * dk] = ctxh.astype(jnp.bfloat16)

    attn = jnp.dot(ctx_ref[...], wo_ref[...],
                   preferred_element_type=jnp.float32) + bo_ref[...]
    x1 = x + attn

    # ---- residual 1: feed-forward on pre-normed input ----------------------
    xn2 = _layernorm(x1, ln2_a_ref[...], ln2_b_ref[...])
    hdn = jnp.maximum(
        jnp.dot(xn2.astype(jnp.bfloat16), w1_ref[...],
                preferred_element_type=jnp.float32) + b1_ref[...],
        0.0,
    )
    ff = jnp.dot(hdn.astype(jnp.bfloat16), w2_ref[...],
                 preferred_element_type=jnp.float32) + b2_ref[...]

    o_ref[...] = (x1 + ff).astype(o_ref.dtype)


def _final_norm_kernel(x_ref, a_ref, b_ref, o_ref):
    o_ref[...] = _layernorm(x_ref[...], a_ref[...], b_ref[...]).astype(o_ref.dtype)


def _vmem_limit_bytes(S, D, d_ff):
    """Rough working-set estimate (weights double-buffered) with 2x headroom."""
    bf16, f32 = 2, 4
    weights = (3 * D * D + D * D + 2 * D * d_ff) * bf16
    biases = (3 * D + 2 * D + d_ff + 4) * f32
    io = 2 * 2 * S * D * f32 + 2 * S * S * f32            # x / out / mask (double-buffered)
    acts = (S * D * f32) * 6 + S * 3 * D * (f32 + bf16) \
        + S * S * f32 * 4 + S * d_ff * (f32 + bf16) + S * D * bf16
    est = 2 * weights + biases + io + acts
    return int(min(max(2 * est, 8 * 1024 * 1024), 48 * 1024 * 1024))


def encoder_block(x, mask, p, *, num_heads: int):
    """x: (B, S, D) f32, mask: (1, S, S) f32 (0 = masked out)."""
    B, S, D = x.shape
    d_ff = p["w1"].shape[1]

    def full2(shape):
        return pl.BlockSpec(shape, lambda b: (0, 0))

    in_specs = [
        pl.BlockSpec((pl.Squeezed(), S, D), lambda b: (b, 0, 0)),   # x
        pl.BlockSpec((pl.Squeezed(), S, S), lambda b: (0, 0, 0)),   # mask (batch 1)
        full2((D, 3 * D)), full2((1, 3 * D)),                       # wqkv, bqkv
        full2((D, D)), full2((1, D)),                               # wo, bo
        full2((1, 1)), full2((1, 1)),                               # ln1 alpha, beta
        full2((D, d_ff)), full2((1, d_ff)),                         # w1, b1
        full2((d_ff, D)), full2((1, D)),                            # w2, b2
        full2((1, 1)), full2((1, 1)),                               # ln2 alpha, beta
    ]

    kernel = functools.partial(_encoder_block_kernel, num_heads=num_heads)

    return pl.pallas_call(
        kernel,
        out_shape=jax.ShapeDtypeStruct((B, S, D), x.dtype),
        grid_spec=pltpu.PrefetchScalarGridSpec(
            num_scalar_prefetch=0,
            grid=(B,),
            in_specs=in_specs,
            out_specs=pl.BlockSpec((pl.Squeezed(), S, D), lambda b: (b, 0, 0)),
            scratch_shapes=[pltpu.VMEM((S, D), jnp.bfloat16)],
        ),
        compiler_params=pltpu.CompilerParams(
            dimension_semantics=("parallel",),
            vmem_limit_bytes=_vmem_limit_bytes(S, D, d_ff),
        ),
    )(
        x, mask,
        p["wqkv"], p["bqkv"], p["wo"], p["bo"],
        p["ln1_alpha"], p["ln1_beta"],
        p["w1"], p["b1"], p["w2"], p["b2"],
        p["ln2_alpha"], p["ln2_beta"],
    )


def final_layernorm(x, alpha, beta):
    B, S, D = x.shape
    return pl.pallas_call(
        _final_norm_kernel,
        out_shape=jax.ShapeDtypeStruct((B, S, D), x.dtype),
        grid_spec=pltpu.PrefetchScalarGridSpec(
            num_scalar_prefetch=0,
            grid=(B,),
            in_specs=[
                pl.BlockSpec((pl.Squeezed(), S, D), lambda b: (b, 0, 0)),
                pl.BlockSpec((1, 1), lambda b: (0, 0)),
                pl.BlockSpec((1, 1), lambda b: (0, 0)),
            ],
            out_specs=pl.BlockSpec((pl.Squeezed(), S, D), lambda b: (b, 0, 0)),
        ),
        compiler_params=pltpu.CompilerParams(dimension_semantics=("parallel",)),
    )(x, alpha, beta)


def encoder(x, mask, layer_params, norm_params, *, num_heads: int):
    """Encoder.forward: for layer in layers: x = layer(x, mask); return norm(x)."""
    for p in layer_params:
        x = encoder_block(x, mask, p, num_heads=num_heads)
    return final_layernorm(x, norm_params["alpha"], norm_params["beta"])


def init_layer_params(key, d_model, d_ff):
    ks = jax.random.split(key, 4)

    def lin(k, n_in, n_out):
        # bf16 weights in HBM: half the DMA bytes, native MXU dtype on v6e/v7x.
        return (jax.random.normal(k, (n_in, n_out), jnp.float32) * 0.05).astype(jnp.bfloat16)

    return {
        "wqkv": lin(ks[0], d_model, 3 * d_model),            # concat([wq, wk, wv], axis=1)
        "bqkv": jnp.zeros((1, 3 * d_model), jnp.float32),
        "wo": lin(ks[1], d_model, d_model),
        "bo": jnp.zeros((1, d_model), jnp.float32),
        "w1": lin(ks[2], d_model, d_ff),
        "b1": jnp.zeros((1, d_ff), jnp.float32),
        "w2": lin(ks[3], d_ff, d_model),
        "b2": jnp.zeros((1, d_model), jnp.float32),
        # LayerNormalisation params (scalar alpha=1, beta=0), stored (1,1) for VMEM.
        "ln1_alpha": jnp.ones((1, 1), jnp.float32), "ln1_beta": jnp.zeros((1, 1), jnp.float32),
        "ln2_alpha": jnp.ones((1, 1), jnp.float32), "ln2_beta": jnp.zeros((1, 1), jnp.float32),
    }


if __name__ == "__main__":
    # Small, lane-dense config: D multiple of 128 so all stores are unmasked.
    B, S, D, H, DFF, N_LAYERS = 2, 16, 128, 4, 256, 2

    key = jax.random.PRNGKey(0)
    keys = jax.random.split(key, N_LAYERS + 1)
    x = jax.random.normal(keys[0], (B, S, D), jnp.float32)

    # src_mask: (1, S, S) float, 1 = attend, 0 = masked (lower-triangular just to
    # exercise the masking path).
    mask = jnp.tril(jnp.ones((S, S), jnp.float32))[None, :, :]

    layer_params = [init_layer_params(k, D, DFF) for k in keys[1:]]
    norm_params = {"alpha": jnp.ones((1, 1), jnp.float32),
                   "beta": jnp.zeros((1, 1), jnp.float32)}

    out = encoder(x, mask, layer_params, norm_params, num_heads=H)
    jax.block_until_ready(out)
    assert out.shape == (B, S, D)
    print("KERNEL_OK")
</pallas_src>

<mosaic_0001>
module attributes {stable_mosaic.version = 11 : i64} {
  func.func @_encoder_block_kernel(%arg0: i32, %arg1: memref<1x16x128xf32, #tpu.memory_space<vmem>>, %arg2: memref<1x16x16xf32, #tpu.memory_space<vmem>>, %arg3: memref<128x384xbf16, #tpu.memory_space<vmem>>, %arg4: memref<1x384xf32, #tpu.memory_space<vmem>>, %arg5: memref<128x128xbf16, #tpu.memory_space<vmem>>, %arg6: memref<1x128xf32, #tpu.memory_space<vmem>>, %arg7: memref<1x1xf32, #tpu.memory_space<vmem>>, %arg8: memref<1x1xf32, #tpu.memory_space<vmem>>, %arg9: memref<128x256xbf16, #tpu.memory_space<vmem>>, %arg10: memref<1x256xf32, #tpu.memory_space<vmem>>, %arg11: memref<256x128xbf16, #tpu.memory_space<vmem>>, %arg12: memref<1x128xf32, #tpu.memory_space<vmem>>, %arg13: memref<1x1xf32, #tpu.memory_space<vmem>>, %arg14: memref<1x1xf32, #tpu.memory_space<vmem>>, %arg15: memref<1x16x128xf32, #tpu.memory_space<vmem>>, %arg16: memref<16x128xbf16, #tpu.memory_space<vmem>>) attributes {dimension_semantics = [#tpu.dimension_semantics<parallel>], iteration_bounds = array<i64: 2>, scalar_prefetch = 0 : i64, scratch_operands = 1 : i64, tpu.core_type = #tpu.core_type<tc>, window_params = [{transform_indices = @transform_0, window_bounds = array<i64: 1, 16, 128>}, {pipeline_mode = #tpu.pipeline_mode<synchronous>, transform_indices = @transform_1, window_bounds = array<i64: 1, 16, 16>}, {pipeline_mode = #tpu.pipeline_mode<synchronous>, transform_indices = @transform_2, window_bounds = array<i64: 128, 384>}, {pipeline_mode = #tpu.pipeline_mode<synchronous>, transform_indices = @transform_3, window_bounds = array<i64: 1, 384>}, {pipeline_mode = #tpu.pipeline_mode<synchronous>, transform_indices = @transform_4, window_bounds = array<i64: 128, 128>}, {pipeline_mode = #tpu.pipeline_mode<synchronous>, transform_indices = @transform_5, window_bounds = array<i64: 1, 128>}, {pipeline_mode = #tpu.pipeline_mode<synchronous>, transform_indices = @transform_6, window_bounds = array<i64: 1, 1>}, {pipeline_mode = #tpu.pipeline_mode<synchronous>, transform_indices = @transform_7, window_bounds = array<i64: 1, 1>}, {pipeline_mode = #tpu.pipeline_mode<synchronous>, transform_indices = @transform_8, window_bounds = array<i64: 128, 256>}, {pipeline_mode = #tpu.pipeline_mode<synchronous>, transform_indices = @transform_9, window_bounds = array<i64: 1, 256>}, {pipeline_mode = #tpu.pipeline_mode<synchronous>, transform_indices = @transform_10, window_bounds = array<i64: 256, 128>}, {pipeline_mode = #tpu.pipeline_mode<synchronous>, transform_indices = @transform_11, window_bounds = array<i64: 1, 128>}, {pipeline_mode = #tpu.pipeline_mode<synchronous>, transform_indices = @transform_12, window_bounds = array<i64: 1, 1>}, {pipeline_mode = #tpu.pipeline_mode<synchronous>, transform_indices = @transform_13, window_bounds = array<i64: 1, 1>}, {transform_indices = @transform_14, window_bounds = array<i64: 1, 16, 128>}]} {
    %c0 = arith.constant 0 : index
    %c0_0 = arith.constant 0 : index
    %c0_1 = arith.constant 0 : index
    %0 = vector.load %arg1[%c0, %c0_0, %c0_1] : memref<1x16x128xf32, #tpu.memory_space<vmem>>, vector<1x16x128xf32>
    %1 = vector.shape_cast %0 : vector<1x16x128xf32> to vector<16x128xf32>
    %c0_2 = arith.constant 0 : index
    %c0_3 = arith.constant 0 : index
    %c0_4 = arith.constant 0 : index
    %2 = vector.load %arg2[%c0_2, %c0_3, %c0_4] : memref<1x16x16xf32, #tpu.memory_space<vmem>>, vector<1x16x16xf32>
    %3 = vector.shape_cast %2 : vector<1x16x16xf32> to vector<16x16xf32>
    %cst = arith.constant 0.000000e+00 : f32
    %4 = vector.broadcast %cst : f32 to vector<16x16xf32>
    %5 = arith.cmpf oeq, %3, %4 : vector<16x16xf32>
    %c0_5 = arith.constant 0 : index
    %c0_6 = arith.constant 0 : index
    %6 = vector.load %arg7[%c0_5, %c0_6] : memref<1x1xf32, #tpu.memory_space<vmem>>, vector<1x1xf32>
    %c0_7 = arith.constant 0 : index
    %c0_8 = arith.constant 0 : index
    %7 = vector.load %arg8[%c0_7, %c0_8] : memref<1x1xf32, #tpu.memory_space<vmem>>, vector<1x1xf32>
    %cst_9 = arith.constant dense<0.000000e+00> : vector<16xf32>
    %8 = vector.multi_reduction <add>, %1, %cst_9 [1] : vector<16x128xf32> to vector<16xf32>
    %9 = vector.shape_cast %8 : vector<16xf32> to vector<16x1xf32>
    %cst_10 = arith.constant 1.280000e+02 : f32
    %10 = vector.broadcast %cst_10 : f32 to vector<16x1xf32>
    %11 = arith.divf %9, %10 : vector<16x1xf32>
    %12 = vector.broadcast %11 : vector<16x1xf32> to vector<16x128xf32>
    %13 = arith.subf %1, %12 : vector<16x128xf32>
    %14 = arith.mulf %13, %13 : vector<16x128xf32>
    %cst_11 = arith.constant dense<0.000000e+00> : vector<16xf32>
    %15 = vector.multi_reduction <add>, %14, %cst_11 [1] : vector<16x128xf32> to vector<16xf32>
    %16 = vector.shape_cast %15 : vector<16xf32> to vector<16x1xf32>
    %cst_12 = arith.constant 0.00787401571 : f32
    %17 = vector.broadcast %cst_12 : f32 to vector<16x1xf32>
    %18 = arith.mulf %16, %17 : vector<16x1xf32>
    %19 = math.sqrt %18 : vector<16x1xf32>
    %cst_13 = arith.constant 9.99999997E-7 : f32
    %20 = vector.broadcast %cst_13 : f32 to vector<16x1xf32>
    %21 = arith.addf %19, %20 : vector<16x1xf32>
    %22 = tpu.reciprocal %21 {approx = true} : vector<16x1xf32> -> vector<16x1xf32>
    %23 = vector.broadcast %22 : vector<16x1xf32> to vector<16x128xf32>
    %24 = arith.mulf %13, %23 : vector<16x128xf32>
    %25 = vector.broadcast %6 : vector<1x1xf32> to vector<16x128xf32>
    %26 = arith.mulf %25, %24 : vector<16x128xf32>
    %27 = vector.broadcast %7 : vector<1x1xf32> to vector<16x128xf32>
    %28 = arith.addf %26, %27 : vector<16x128xf32>
    %29 = arith.truncf %28 : vector<16x128xf32> to vector<16x128xbf16>
    %c0_14 = arith.constant 0 : index
    %c0_15 = arith.constant 0 : index
    %30 = vector.load %arg3[%c0_14, %c0_15] : memref<128x384xbf16, #tpu.memory_space<vmem>>, vector<128x384xbf16>
    %cst_16 = arith.constant dense<0.000000e+00> : vector<16x384xf32>
    %31 = tpu.matmul %29, %30, %cst_16 {dimension_numbers = #tpu.dot_dimension_numbers<[1], [0], [0], [1], [0, 0, 1, 1], [], []>} : vector<16x128xbf16>, vector<128x384xbf16>, vector<16x384xf32> -> vector<16x384xf32>
    %c0_17 = arith.constant 0 : index
    %c0_18 = arith.constant 0 : index
    %32 = vector.load %arg4[%c0_17, %c0_18] : memref<1x384xf32, #tpu.memory_space<vmem>>, vector<1x384xf32>
    %33 = vector.broadcast %32 : vector<1x384xf32> to vector<16x384xf32>
    %34 = arith.addf %31, %33 : vector<16x384xf32>
    %35 = arith.truncf %34 : vector<16x384xf32> to vector<16x384xbf16>
    %36 = vector.extract_strided_slice %35 {offsets = [0, 0], sizes = [16, 32], strides = [1, 1]} : vector<16x384xbf16> to vector<16x32xbf16>
    %37 = vector.extract_strided_slice %35 {offsets = [0, 128], sizes = [16, 32], strides = [1, 1]} : vector<16x384xbf16> to vector<16x32xbf16>
    %38 = vector.extract_strided_slice %35 {offsets = [0, 256], sizes = [16, 32], strides = [1, 1]} : vector<16x384xbf16> to vector<16x32xbf16>
    %cst_19 = arith.constant dense<0.000000e+00> : vector<16x16xf32>
    %39 = tpu.matmul %36, %37, %cst_19 {dimension_numbers = #tpu.dot_dimension_numbers<[1], [1], [0], [0], [0, 0, 1, 0], [], []>} : vector<16x32xbf16>, vector<16x32xbf16>, vector<16x16xf32> -> vector<16x16xf32>
    %cst_20 = arith.constant 0.176776692 : f32
    %40 = vector.broadcast %cst_20 : f32 to vector<16x16xf32>
    %41 = arith.mulf %39, %40 : vector<16x16xf32>
    %cst_21 = arith.constant -1.000000e+09 : f32
    %42 = vector.broadcast %cst_21 : f32 to vector<16x16xf32>
    %43 = arith.select %5, %42, %41 : vector<16x16xi1>, vector<16x16xf32>
    %cst_22 = arith.constant dense<0xFF800000> : vector<16xf32>
    %44 = vector.multi_reduction <maximumf>, %43, %cst_22 [1] : vector<16x16xf32> to vector<16xf32>
    %45 = vector.shape_cast %44 : vector<16xf32> to vector<16x1xf32>
    %46 = vector.broadcast %45 : vector<16x1xf32> to vector<16x16xf32>
    %47 = arith.subf %43, %46 : vector<16x16xf32>
    %48 = math.exp %47 : vector<16x16xf32>
    %cst_23 = arith.constant dense<0.000000e+00> : vector<16xf32>
    %49 = vector.multi_reduction <add>, %48, %cst_23 [1] : vector<16x16xf32> to vector<16xf32>
    %50 = vector.shape_cast %49 : vector<16xf32> to vector<16x1xf32>
    %51 = tpu.reciprocal %50 {approx = true} : vector<16x1xf32> -> vector<16x1xf32>
    %52 = vector.broadcast %51 : vector<16x1xf32> to vector<16x16xf32>
    %53 = arith.mulf %48, %52 : vector<16x16xf32>
    %54 = arith.truncf %53 : vector<16x16xf32> to vector<16x16xbf16>
    %cst_24 = arith.constant dense<0.000000e+00> : vector<16x32xf32>
    %55 = tpu.matmul %54, %38, %cst_24 {dimension_numbers = #tpu.dot_dimension_numbers<[1], [0], [0], [1], [0, 0, 1, 1], [], []>} : vector<16x16xbf16>, vector<16x32xbf16>, vector<16x32xf32> -> vector<16x32xf32>
    %56 = arith.truncf %55 : vector<16x32xf32> to vector<16x32xbf16>
    %c0_25 = arith.constant 0 : index
    %c0_26 = arith.constant 0 : index
    %57 = vector.load %arg16[%c0_25, %c0_26] : memref<16x128xbf16, #tpu.memory_space<vmem>>, vector<16x32xbf16>
    tpu.vector_store %arg16[%c0_25, %c0_26], %56 {strides = array<i32>} : memref<16x128xbf16, #tpu.memory_space<vmem>>, vector<16x32xbf16>,
    %58 = vector.extract_strided_slice %35 {offsets = [0, 32], sizes = [16, 32], strides = [1, 1]} : vector<16x384xbf16> to vector<16x32xbf16>
    %59 = vector.extract_strided_slice %35 {offsets = [0, 160], sizes = [16, 32], strides = [1, 1]} : vector<16x384xbf16> to vector<16x32xbf16>
    %60 = vector.extract_strided_slice %35 {offsets = [0, 288], sizes = [16, 32], strides = [1, 1]} : vector<16x384xbf16> to vector<16x32xbf16>
    %cst_27 = arith.constant dense<0.000000e+00> : vector<16x16xf32>
    %61 = tpu.matmul %58, %59, %cst_27 {dimension_numbers = #tpu.dot_dimension_numbers<[1], [1], [0], [0], [0, 0, 1, 0], [], []>} : vector<16x32xbf16>, vector<16x32xbf16>, vector<16x16xf32> -> vector<16x16xf32>
    %cst_28 = arith.constant 0.176776692 : f32
    %62 = vector.broadcast %cst_28 : f32 to vector<16x16xf32>
    %63 = arith.mulf %61, %62 : vector<16x16xf32>
    %cst_29 = arith.constant -1.000000e+09 : f32
    %64 = vector.broadcast %cst_29 : f32 to vector<16x16xf32>
    %65 = arith.select %5, %64, %63 : vector<16x16xi1>, vector<16x16xf32>
    %cst_30 = arith.constant dense<0xFF800000> : vector<16xf32>
    %66 = vector.multi_reduction <maximumf>, %65, %cst_30 [1] : vector<16x16xf32> to vector<16xf32>
    %67 = vector.shape_cast %66 : vector<16xf32> to vector<16x1xf32>
    %68 = vector.broadcast %67 : vector<16x1xf32> to vector<16x16xf32>
    %69 = arith.subf %65, %68 : vector<16x16xf32>
    %70 = math.exp %69 : vector<16x16xf32>
    %cst_31 = arith.constant dense<0.000000e+00> : vector<16xf32>
    %71 = vector.multi_reduction <add>, %70, %cst_31 [1] : vector<16x16xf32> to vector<16xf32>
    %72 = vector.shape_cast %71 : vector<16xf32> to vector<16x1xf32>
    %73 = tpu.reciprocal %72 {approx = true} : vector<16x1xf32> -> vector<16x1xf32>
    %74 = vector.broadcast %73 : vector<16x1xf32> to vector<16x16xf32>
    %75 = arith.mulf %70, %74 : vector<16x16xf32>
    %76 = arith.truncf %75 : vector<16x16xf32> to vector<16x16xbf16>
    %cst_32 = arith.constant dense<0.000000e+00> : vector<16x32xf32>
    %77 = tpu.matmul %76, %60, %cst_32 {dimension_numbers = #tpu.dot_dimension_numbers<[1], [0], [0], [1], [0, 0, 1, 1], [], []>} : vector<16x16xbf16>, vector<16x32xbf16>, vector<16x32xf32> -> vector<16x32xf32>
    %78 = arith.truncf %77 : vector<16x32xf32> to vector<16x32xbf16>
    %c0_33 = arith.constant 0 : index
    %c32 = arith.constant 32 : index
    %79 = vector.load %arg16[%c0_33, %c32] : memref<16x128xbf16, #tpu.memory_space<vmem>>, vector<16x32xbf16>
    tpu.vector_store %arg16[%c0_33, %c32], %78 {strides = array<i32>} : memref<16x128xbf16, #tpu.memory_space<vmem>>, vector<16x32xbf16>,
    %80 = vector.extract_strided_slice %35 {offsets = [0, 64], sizes = [16, 32], strides = [1, 1]} : vector<16x384xbf16> to vector<16x32xbf16>
    %81 = vector.extract_strided_slice %35 {offsets = [0, 192], sizes = [16, 32], strides = [1, 1]} : vector<16x384xbf16> to vector<16x32xbf16>
    %82 = vector.extract_strided_slice %35 {offsets = [0, 320], sizes = [16, 32], strides = [1, 1]} : vector<16x384xbf16> to vector<16x32xbf16>
    %cst_34 = arith.constant dense<0.000000e+00> : vector<16x16xf32>
    %83 = tpu.matmul %80, %81, %cst_34 {dimension_numbers = #tpu.dot_dimension_numbers<[1], [1], [0], [0], [0, 0, 1, 0], [], []>} : vector<16x32xbf16>, vector<16x32xbf16>, vector<16x16xf32> -> vector<16x16xf32>
    %cst_35 = arith.constant 0.176776692 : f32
    %84 = vector.broadcast %cst_35 : f32 to vector<16x16xf32>
    %85 = arith.mulf %83, %84 : vector<16x16xf32>
    %cst_36 = arith.constant -1.000000e+09 : f32
    %86 = vector.broadcast %cst_36 : f32 to vector<16x16xf32>
    %87 = arith.select %5, %86, %85 : vector<16x16xi1>, vector<16x16xf32>
    %cst_37 = arith.constant dense<0xFF800000> : vector<16xf32>
    %88 = vector.multi_reduction <maximumf>, %87, %cst_37 [1] : vector<16x16xf32> to vector<16xf32>
    %89 = vector.shape_cast %88 : vector<16xf32> to vector<16x1xf32>
    %90 = vector.broadcast %89 : vector<16x1xf32> to vector<16x16xf32>
    %91 = arith.subf %87, %90 : vector<16x16xf32>
    %92 = math.exp %91 : vector<16x16xf32>
    %cst_38 = arith.constant dense<0.000000e+00> : vector<16xf32>
    %93 = vector.multi_reduction <add>, %92, %cst_38 [1] : vector<16x16xf32> to vector<16xf32>
    %94 = vector.shape_cast %93 : vector<16xf32> to vector<16x1xf32>
    %95 = tpu.reciprocal %94 {approx = true} : vector<16x1xf32> -> vector<16x1xf32>
    %96 = vector.broadcast %95 : vector<16x1xf32> to vector<16x16xf32>
    %97 = arith.mulf %92, %96 : vector<16x16xf32>
    %98 = arith.truncf %97 : vector<16x16xf32> to vector<16x16xbf16>
    %cst_39 = arith.constant dense<0.000000e+00> : vector<16x32xf32>
    %99 = tpu.matmul %98, %82, %cst_39 {dimension_numbers = #tpu.dot_dimension_numbers<[1], [0], [0], [1], [0, 0, 1, 1], [], []>} : vector<16x16xbf16>, vector<16x32xbf16>, vector<16x32xf32> -> vector<16x32xf32>
    %100 = arith.truncf %99 : vector<16x32xf32> to vector<16x32xbf16>
    %c0_40 = arith.constant 0 : index
    %c64 = arith.constant 64 : index
    %101 = vector.load %arg16[%c0_40, %c64] : memref<16x128xbf16, #tpu.memory_space<vmem>>, vector<16x32xbf16>
    tpu.vector_store %arg16[%c0_40, %c64], %100 {strides = array<i32>} : memref<16x128xbf16, #tpu.memory_space<vmem>>, vector<16x32xbf16>,
    %102 = vector.extract_strided_slice %35 {offsets = [0, 96], sizes = [16, 32], strides = [1, 1]} : vector<16x384xbf16> to vector<16x32xbf16>
    %103 = vector.extract_strided_slice %35 {offsets = [0, 224], sizes = [16, 32], strides = [1, 1]} : vector<16x384xbf16> to vector<16x32xbf16>
    %104 = vector.extract_strided_slice %35 {offsets = [0, 352], sizes = [16, 32], strides = [1, 1]} : vector<16x384xbf16> to vector<16x32xbf16>
    %cst_41 = arith.constant dense<0.000000e+00> : vector<16x16xf32>
    %105 = tpu.matmul %102, %103, %cst_41 {dimension_numbers = #tpu.dot_dimension_numbers<[1], [1], [0], [0], [0, 0, 1, 0], [], []>} : vector<16x32xbf16>, vector<16x32xbf16>, vector<16x16xf32> -> vector<16x16xf32>
    %cst_42 = arith.constant 0.176776692 : f32
    %106 = vector.broadcast %cst_42 : f32 to vector<16x16xf32>
    %107 = arith.mulf %105, %106 : vector<16x16xf32>
    %cst_43 = arith.constant -1.000000e+09 : f32
    %108 = vector.broadcast %cst_43 : f32 to vector<16x16xf32>
    %109 = arith.select %5, %108, %107 : vector<16x16xi1>, vector<16x16xf32>
    %cst_44 = arith.constant dense<0xFF800000> : vector<16xf32>
    %110 = vector.multi_reduction <maximumf>, %109, %cst_44 [1] : vector<16x16xf32> to vector<16xf32>
    %111 = vector.shape_cast %110 : vector<16xf32> to vector<16x1xf32>
    %112 = vector.broadcast %111 : vector<16x1xf32> to vector<16x16xf32>
    %113 = arith.subf %109, %112 : vector<16x16xf32>
    %114 = math.exp %113 : vector<16x16xf32>
    %cst_45 = arith.constant dense<0.000000e+00> : vector<16xf32>
    %115 = vector.multi_reduction <add>, %114, %cst_45 [1] : vector<16x16xf32> to vector<16xf32>
    %116 = vector.shape_cast %115 : vector<16xf32> to vector<16x1xf32>
    %117 = tpu.reciprocal %116 {approx = true} : vector<16x1xf32> -> vector<16x1xf32>
    %118 = vector.broadcast %117 : vector<16x1xf32> to vector<16x16xf32>
    %119 = arith.mulf %114, %118 : vector<16x16xf32>
    %120 = arith.truncf %119 : vector<16x16xf32> to vector<16x16xbf16>
    %cst_46 = arith.constant dense<0.000000e+00> : vector<16x32xf32>
    %121 = tpu.matmul %120, %104, %cst_46 {dimension_numbers = #tpu.dot_dimension_numbers<[1], [0], [0], [1], [0, 0, 1, 1], [], []>} : vector<16x16xbf16>, vector<16x32xbf16>, vector<16x32xf32> -> vector<16x32xf32>
    %122 = arith.truncf %121 : vector<16x32xf32> to vector<16x32xbf16>
    %c0_47 = arith.constant 0 : index
    %c96 = arith.constant 96 : index
    %123 = vector.load %arg16[%c0_47, %c96] : memref<16x128xbf16, #tpu.memory_space<vmem>>, vector<16x32xbf16>
    tpu.vector_store %arg16[%c0_47, %c96], %122 {strides = array<i32>} : memref<16x128xbf16, #tpu.memory_space<vmem>>, vector<16x32xbf16>,
    %c0_48 = arith.constant 0 : index
    %c0_49 = arith.constant 0 : index
    %124 = vector.load %arg16[%c0_48, %c0_49] : memref<16x128xbf16, #tpu.memory_space<vmem>>, vector<16x128xbf16>
    %c0_50 = arith.constant 0 : index
    %c0_51 = arith.constant 0 : index
    %125 = vector.load %arg5[%c0_50, %c0_51] : memref<128x128xbf16, #tpu.memory_space<vmem>>, vector<128x128xbf16>
    %cst_52 = arith.constant dense<0.000000e+00> : vector<16x128xf32>
    %126 = tpu.matmul %124, %125, %cst_52 {dimension_numbers = #tpu.dot_dimension_numbers<[1], [0], [0], [1], [0, 0, 1, 1], [], []>} : vector<16x128xbf16>, vector<128x128xbf16>, vector<16x128xf32> -> vector<16x128xf32>
    %c0_53 = arith.constant 0 : index
    %c0_54 = arith.constant 0 : index
    %127 = vector.load %arg6[%c0_53, %c0_54] : memref<1x128xf32, #tpu.memory_space<vmem>>, vector<1x128xf32>
    %128 = vector.broadcast %127 : vector<1x128xf32> to vector<16x128xf32>
    %129 = arith.addf %126, %128 : vector<16x128xf32>
    %130 = arith.addf %1, %129 : vector<16x128xf32>
    %c0_55 = arith.constant 0 : index
    %c0_56 = arith.constant 0 : index
    %131 = vector.load %arg13[%c0_55, %c0_56] : memref<1x1xf32, #tpu.memory_space<vmem>>, vector<1x1xf32>
    %c0_57 = arith.constant 0 : index
    %c0_58 = arith.constant 0 : index
    %132 = vector.load %arg14[%c0_57, %c0_58] : memref<1x1xf32, #tpu.memory_space<vmem>>, vector<1x1xf32>
    %cst_59 = arith.constant dense<0.000000e+00> : vector<16xf32>
    %133 = vector.multi_reduction <add>, %130, %cst_59 [1] : vector<16x128xf32> to vector<16xf32>
    %134 = vector.shape_cast %133 : vector<16xf32> to vector<16x1xf32>
    %cst_60 = arith.constant 1.280000e+02 : f32
    %135 = vector.broadcast %cst_60 : f32 to vector<16x1xf32>
    %136 = arith.divf %134, %135 : vector<16x1xf32>
    %137 = vector.broadcast %136 : vector<16x1xf32> to vector<16x128xf32>
    %138 = arith.subf %130, %137 : vector<16x128xf32>
    %139 = arith.mulf %138, %138 : vector<16x128xf32>
    %cst_61 = arith.constant dense<0.000000e+00> : vector<16xf32>
    %140 = vector.multi_reduction <add>, %139, %cst_61 [1] : vector<16x128xf32> to vector<16xf32>
    %141 = vector.shape_cast %140 : vector<16xf32> to vector<16x1xf32>
    %cst_62 = arith.constant 0.00787401571 : f32
    %142 = vector.broadcast %cst_62 : f32 to vector<16x1xf32>
    %143 = arith.mulf %141, %142 : vector<16x1xf32>
    %144 = math.sqrt %143 : vector<16x1xf32>
    %cst_63 = arith.constant 9.99999997E-7 : f32
    %145 = vector.broadcast %cst_63 : f32 to vector<16x1xf32>
    %146 = arith.addf %144, %145 : vector<16x1xf32>
    %147 = tpu.reciprocal %146 {approx = true} : vector<16x1xf32> -> vector<16x1xf32>
    %148 = vector.broadcast %147 : vector<16x1xf32> to vector<16x128xf32>
    %149 = arith.mulf %138, %148 : vector<16x128xf32>
    %150 = vector.broadcast %131 : vector<1x1xf32> to vector<16x128xf32>
    %151 = arith.mulf %150, %149 : vector<16x128xf32>
    %152 = vector.broadcast %132 : vector<1x1xf32> to vector<16x128xf32>
    %153 = arith.addf %151, %152 : vector<16x128xf32>
    %154 = arith.truncf %153 : vector<16x128xf32> to vector<16x128xbf16>
    %c0_64 = arith.constant 0 : index
    %c0_65 = arith.constant 0 : index
    %155 = vector.load %arg9[%c0_64, %c0_65] : memref<128x256xbf16, #tpu.memory_space<vmem>>, vector<128x256xbf16>
    %cst_66 = arith.constant dense<0.000000e+00> : vector<16x256xf32>
    %156 = tpu.matmul %154, %155, %cst_66 {dimension_numbers = #tpu.dot_dimension_numbers<[1], [0], [0], [1], [0, 0, 1, 1], [], []>} : vector<16x128xbf16>, vector<128x256xbf16>, vector<16x256xf32> -> vector<16x256xf32>
    %c0_67 = arith.constant 0 : index
    %c0_68 = arith.constant 0 : index
    %157 = vector.load %arg10[%c0_67, %c0_68] : memref<1x256xf32, #tpu.memory_space<vmem>>, vector<1x256xf32>
    %158 = vector.broadcast %157 : vector<1x256xf32> to vector<16x256xf32>
    %159 = arith.addf %156, %158 : vector<16x256xf32>
    %cst_69 = arith.constant 0.000000e+00 : f32
    %160 = vector.broadcast %cst_69 : f32 to vector<16x256xf32>
    %161 = arith.maximumf %159, %160 : vector<16x256xf32>
    %162 = arith.truncf %161 : vector<16x256xf32> to vector<16x256xbf16>
    %c0_70 = arith.constant 0 : index
    %c0_71 = arith.constant 0 : index
    %163 = vector.load %arg11[%c0_70, %c0_71] : memref<256x128xbf16, #tpu.memory_space<vmem>>, vector<256x128xbf16>
    %cst_72 = arith.constant dense<0.000000e+00> : vector<16x128xf32>
    %164 = tpu.matmul %162, %163, %cst_72 {dimension_numbers = #tpu.dot_dimension_numbers<[1], [0], [0], [1], [0, 0, 1, 1], [], []>} : vector<16x256xbf16>, vector<256x128xbf16>, vector<16x128xf32> -> vector<16x128xf32>
    %c0_73 = arith.constant 0 : index
    %c0_74 = arith.constant 0 : index
    %165 = vector.load %arg12[%c0_73, %c0_74] : memref<1x128xf32, #tpu.memory_space<vmem>>, vector<1x128xf32>
    %166 = vector.broadcast %165 : vector<1x128xf32> to vector<16x128xf32>
    %167 = arith.addf %164, %166 : vector<16x128xf32>
    %168 = arith.addf %130, %167 : vector<16x128xf32>
    %c0_75 = arith.constant 0 : index
    %c0_76 = arith.constant 0 : index
    %c0_77 = arith.constant 0 : index
    %169 = vector.load %arg15[%c0_75, %c0_76, %c0_77] : memref<1x16x128xf32, #tpu.memory_space<vmem>>, vector<1x16x128xf32>
    %170 = vector.shape_cast %169 : vector<1x16x128xf32> to vector<16x128xf32>
    %171 = vector.shape_cast %168 : vector<16x128xf32> to vector<1x16x128xf32>
    tpu.vector_store %arg15[%c0_75, %c0_76, %c0_77], %171 {strides = array<i32>} : memref<1x16x128xf32, #tpu.memory_space<vmem>>, vector<1x16x128xf32>,
    return
  }
  func.func @transform_0(%arg0: i32) -> (i32, i32, i32) {
    %c0_i32 = arith.constant 0 : i32
    %c0_i32_0 = arith.constant 0 : i32
    %c0_i32_1 = arith.constant 0 : i32
    return %arg0, %c0_i32, %c0_i32_0 : i32, i32, i32
  }
  func.func @transform_1(%arg0: i32) -> (i32, i32, i32) {
    %c0_i32 = arith.constant 0 : i32
    %c0_i32_0 = arith.constant 0 : i32
    %c0_i32_1 = arith.constant 0 : i32
    %c0_i32_2 = arith.constant 0 : i32
    return %c0_i32, %c0_i32_0, %c0_i32_1 : i32, i32, i32
  }
  func.func @transform_2(%arg0: i32) -> (i32, i32) {
    %c0_i32 = arith.constant 0 : i32
    %c0_i32_0 = arith.constant 0 : i32
    %c0_i32_1 = arith.constant 0 : i32
    return %c0_i32, %c0_i32_0 : i32, i32
  }
  func.func @transform_3(%arg0: i32) -> (i32, i32) {
    %c0_i32 = arith.constant 0 : i32
    %c0_i32_0 = arith.constant 0 : i32
    %c0_i32_1 = arith.constant 0 : i32
    return %c0_i32, %c0_i32_0 : i32, i32
  }
  func.func @transform_4(%arg0: i32) -> (i32, i32) {
    %c0_i32 = arith.constant 0 : i32
    %c0_i32_0 = arith.constant 0 : i32
    %c0_i32_1 = arith.constant 0 : i32
    return %c0_i32, %c0_i32_0 : i32, i32
  }
  func.func @transform_5(%arg0: i32) -> (i32, i32) {
    %c0_i32 = arith.constant 0 : i32
    %c0_i32_0 = arith.constant 0 : i32
    %c0_i32_1 = arith.constant 0 : i32
    return %c0_i32, %c0_i32_0 : i32, i32
  }
  func.func @transform_6(%arg0: i32) -> (i32, i32) {
    %c0_i32 = arith.constant 0 : i32
    %c0_i32_0 = arith.constant 0 : i32
    %c0_i32_1 = arith.constant 0 : i32
    return %c0_i32, %c0_i32_0 : i32, i32
  }
  func.func @transform_7(%arg0: i32) -> (i32, i32) {
    %c0_i32 = arith.constant 0 : i32
    %c0_i32_0 = arith.constant 0 : i32
    %c0_i32_1 = arith.constant 0 : i32
    return %c0_i32, %c0_i32_0 : i32, i32
  }
  func.func @transform_8(%arg0: i32) -> (i32, i32) {
    %c0_i32 = arith.constant 0 : i32
    %c0_i32_0 = arith.constant 0 : i32
    %c0_i32_1 = arith.constant 0 : i32
    return %c0_i32, %c0_i32_0 : i32, i32
  }
  func.func @transform_9(%arg0: i32) -> (i32, i32) {
    %c0_i32 = arith.constant 0 : i32
    %c0_i32_0 = arith.constant 0 : i32
    %c0_i32_1 = arith.constant 0 : i32
    return %c0_i32, %c0_i32_0 : i32, i32
  }
  func.func @transform_10(%arg0: i32) -> (i32, i32) {
    %c0_i32 = arith.constant 0 : i32
    %c0_i32_0 = arith.constant 0 : i32
    %c0_i32_1 = arith.constant 0 : i32
    return %c0_i32, %c0_i32_0 : i32, i32
  }
  func.func @transform_11(%arg0: i32) -> (i32, i32) {
    %c0_i32 = arith.constant 0 : i32
    %c0_i32_0 = arith.constant 0 : i32
    %c0_i32_1 = arith.constant 0 : i32
    return %c0_i32, %c0_i32_0 : i32, i32
  }
  func.func @transform_12(%arg0: i32) -> (i32, i32) {
    %c0_i32 = arith.constant 0 : i32
    %c0_i32_0 = arith.constant 0 : i32
    %c0_i32_1 = arith.constant 0 : i32
    return %c0_i32, %c0_i32_0 : i32, i32
  }
  func.func @transform_13(%arg0: i32) -> (i32, i32) {
    %c0_i32 = arith.constant 0 : i32
    %c0_i32_0 = arith.constant 0 : i32
    %c0_i32_1 = arith.constant 0 : i32
    return %c0_i32, %c0_i32_0 : i32, i32
  }
  func.func @transform_14(%arg0: i32) -> (i32, i32, i32) {
    %c0_i32 = arith.constant 0 : i32
    %c0_i32_0 = arith.constant 0 : i32
    %c0_i32_1 = arith.constant 0 : i32
    return %arg0, %c0_i32, %c0_i32_0 : i32, i32, i32
  }
}

</mosaic_0001>

<bundles_post_ra>
// kernel: tpu_custom_call.1
= control target key start
LH: loop header
LB: loop body
LE: loop exit
PB: predicated region body
PF: predicated region fallthrough
CT: control target
= control target key end

     0   :  { %s3318_s0 = inlined_call_operand.hbm [shape: f32[2,16,128], index: 0, kind: input, shape index: {}]   ;;  %s3319_s1 = inlined_call_operand.vmem [shape: f32[1,16,16], index: 1, kind: input, shape index: {}]   ;;  %s3320_s2 = inlined_call_operand.hbm [shape: bf16[128,384], index: 2, kind: input, shape index: {}]   ;;  %s3321_s3 = inlined_call_operand.vmem [shape: f32[1,384], index: 3, kind: input, shape index: {}]   ;;  %s3322_s4 = inlined_call_operand.hbm [shape: bf16[128,128], index: 4, kind: input, shape index: {}]   ;;  %s3323_s5 = inlined_call_operand.vmem [shape: f32[1,128], index: 5, kind: input, shape index: {}]   ;;  %s3324_s6 = inlined_call_operand.<no memory space> [shape: f32[1,1], index: 6, kind: input, shape index: {}]   ;;  %s3325_s8 = inlined_call_operand.hbm [shape: bf16[128,256], index: 8, kind: input, shape index: {}]   ;;  %s3326_s9 = inlined_call_operand.vmem [shape: f32[1,256], index: 9, kind: input, shape index: {}]   ;;  %s3327_s10 = inlined_call_operand.hbm [shape: bf16[256,128], index: 10, kind: input, shape index: {}]   ;;  %s3328_s11 = inlined_call_operand.vmem [shape: f32[1,128], index: 11, kind: input, shape index: {}]   ;;  %s3329_s14 = inlined_call_operand.hbm [shape: f32[2,16,128], index: 14, kind: output, shape index: {}]   ;;  %s3330_s7 = inlined_call_operand.<no memory space> [shape: f32[1,1], index: 7, kind: input, shape index: {}]   ;;  %s3331_s12 = inlined_call_operand.<no memory space> [shape: f32[1,1], index: 12, kind: input, shape index: {}]   ;;  %s3332_s13 = inlined_call_operand.<no memory space> [shape: f32[1,1], index: 13, kind: input, shape index: {}]  }
   0x1   :  { %3341 = sst [smem:[#allocation23_spill]] %s3320_s2  ;;  %v19_v0 = vstv %s3324_s6  ;;  %v21_v1 = vstv %s3330_s7  ;;  %v23_v2 = vstv %s3331_s12  ;;  %v25_v3 = vstv %s3332_s13 }
   0x2   :  { %3342 = sst [smem:[#allocation24_spill]] %s3329_s14  ;;  %20 = vst [vmem:[#allocation3] sm:$0x1] %v19_v0  ;;  %22 = vst [vmem:[#allocation4] sm:$0x1] %v21_v1 }
   0x3   :  { %24 = vst [vmem:[#allocation5] sm:$0x1] %v23_v2  ;;  %26 = vst [vmem:[#allocation6] sm:$0x1] %v25_v3 }
   0x4   :  { %27 = vsyncpa [#allocation8], 0 }
   0x5   :  { %29 = vsyncpa [#allocation8 + $0x1], 0 }
   0x6   :  { %30 = vsyncpa [#allocation11], 0 }
   0x7   :  { %31 = vsyncpa [#allocation14], 0 }
   0x8   :  { %32 = vsyncpa [#allocation9], 0 }
   0x9   :  { %34 = vsyncpa [#allocation9 + $0x1], 0  ;;  %s2846_s6 = smov 0   ;;  %s2848_s7 = smov 0  }
   0xa   :  { %s2850_s21 = smov 0   ;;  %s2852_s12 = smov 0  }
   0xb LB: > { %3343 = sst [smem:[#allocation21_spill]] %s2725_s6  ;;  %s2867_s13 = sadd.s32 4294967295, %s2737_s12   ;;  %s2737_s12 = sphi %s2852_s12, %s3370_s12   ;;  %s2733_s21 = sphi %s2850_s21, %s3369_s21   ;;  %s2729_s7 = sphi %s2848_s7, %s3368_s7   ;;  %s2725_s6 = sphi %s2846_s6, %s3367_s6  }
   0xc   : > { %s2044_s22 = sadd.s32 4294967294, %s2737_s12   ;;  %p60_p0 = scmp.ne.s32.totalorder %s2729_s7, %s2725_s6 }
   0xd   : > { %p3333_p1 = scmp.eq.s32.totalorder %s2867_s13, 0  ;;  %p363_p3 = scmp.eq.s32.totalorder %s2044_s22, 1 }
   0xe   : > { %p2045_p5 = scmp.ge.s32.totalorder %s2737_s12, 1  ;;  %p370_p7 = scmp.lt.s32.totalorder %s2737_s12, 3 }
   0xf   : > { %p2876_p4 = por %p3333_p1, %p60_p0  ;;  %p2881_p6 = por %p363_p3, %p60_p0 }
  0x10   : > { %p2886_p8 = pnand %p2045_p5, %p370_p7  ;;  %s2739_s26 = smov [#allocation10]  }
  0x11   : > { %s3344_s23 = scalar_select %p2876_p4, 1, 0 }
  0x12   : > { %s3345_s24 = scalar_select %p2881_p6, 1, 0 }
  0x13   : > { %s3347_s25 = scalar_select %p2886_p8, 1, 0 }
  0x14   : > { %3346 = sst [smem:[#allocation22_spill]] %s3345_s24  ;;  %s385_s27 = sshll.u32 %s2739_s26, 4  ;;  %s2890_s27 = int_to_ptr.vmem [resolvable:$true] %s385_s27 }
  0x15   : > { %p2310_p9 = pneg %p2886_p8  ;;  %s2740_s29 = smov [#allocation13]  }
  0x16   : > { %s423_s30 = sshll.u32 %s2740_s29, 4  ;;  %s3349_s2 = sld [smem:[#allocation23_spill]]  ;;  %s2901_s30 = int_to_ptr.vmem [resolvable:$true] %s423_s30 }
  0x17   : > { %p2897_p11 = pnand %p2310_p9, %p3333_p1 }
  0x19   : > { %p2911_p13 = pneg %p2897_p11 }
  0x1c   : > { %s2521_s17 = scalar_lea.hbm %s3349_s2, 3072 }
  0x1d   : > { %p2522_p12 = scmp.ne.s32.totalorder %s3349_s2, %s2521_s17  ;;  %p2528_p5 = scmp.lt.u32.totalorder %s2521_s17, %s3349_s2 }
  0x1f   : > { %p2524_p0 = pnand %p2911_p13, %p2522_p12 }
  0x21   : > { %p2525_p3 = pneg %p2524_p0 }
  0x23   : > { %p2530_p7 = pnand %p2528_p5, %p2525_p3 }
  0x25   : > { %2533 = shalt.err (!%p2530_p7)
}
  0x26   : > { %s2534_s29 = scalar_lea.vmem %s2890_s27, 3072  ;;  %p2542_p2 = scmp.lt.s32.totalorder %s2890_s27, %s2890_s27 }
  0x27   : > { %p2535_p9 = scmp.ne.s32.totalorder %s2890_s27, %s2534_s29  ;;  %p2543_p6 = scmp.lt.s32.totalorder %s2534_s29, %s2534_s29 }
  0x29   : > { %p2537_p10 = pnand %p2535_p9, %p2911_p13  ;;  %p2544_p12 = por %p2543_p6, %p2542_p2 }
  0x2b   : > { %p2538_p1 = pneg %p2537_p10 }
  0x2d   : > { %p2545_p0 = pnand %p2544_p12, %p2538_p1 }
  0x2f   : > { %2548 = shalt.err (!%p2545_p0)
}
  0x30   : > { %s2741_s15 = smov 192   ;;  %s2742_s16 = smov 12  }
  0x31   : > { %2313 = dma.hbm_to_vmem [thread:$0]  (!%p2897_p11), %s3349_s2, 3072, %s2890_s27, [#allocation11], %s2741_s15, %s2741_s15, %s2742_s16  }
  0x32   : > { %s2549_s26 = scalar_lea.hbm %s3325_s8, 2048 }
  0x33   : > { %p2550_p2 = scmp.ne.s32.totalorder %s3325_s8, %s2549_s26  ;;  %p2556_p10 = scmp.lt.u32.totalorder %s2549_s26, %s3325_s8 }
  0x35   : > { %p2552_p1 = pnand %p2550_p2, %p2911_p13 }
  0x37   : > { %p2553_p6 = pneg %p2552_p1 }
  0x39   : > { %p2558_p3 = pnand %p2556_p10, %p2553_p6 }
  0x3b   : > { %2561 = shalt.err (!%p2558_p3)
}
  0x3c   : > { %s2562_s27 = scalar_lea.vmem %s2901_s30, 2048  ;;  %p2570_p12 = scmp.lt.s32.totalorder %s2901_s30, %s2901_s30 }
  0x3d   : > { %p2563_p5 = scmp.ne.s32.totalorder %s2901_s30, %s2562_s27  ;;  %p2571_p0 = scmp.lt.s32.totalorder %s2562_s27, %s2562_s27 }
  0x3f   : > { %p2565_p7 = pnand %p2563_p5, %p2911_p13  ;;  %p2572_p2 = por %p2571_p0, %p2570_p12 }
  0x41   : > { %p2566_p9 = pneg %p2565_p7 }
  0x43   : > { %p2573_p1 = pnand %p2572_p2, %p2566_p9 }
  0x45   : > { %2576 = shalt.err (!%p2573_p1)
}
  0x46   : > { %s3339_s6 = smov 128   ;;  %s3340_s14 = smov 8  }
  0x47   : > { %2319 = dma.hbm_to_vmem [thread:$0]  (!%p2897_p11), %s3325_s8, 2048, %s2901_s30, [#allocation14], %s3339_s6, %s3339_s6, %s3340_s14  }
  0x48   : > { %s2745_s16 = smov [#allocation12]   ;;  %s2577_s22 = scalar_lea.hbm %s3322_s4, 1024 }
  0x49   : > { %s401_s17 = sshll.u32 %s2745_s16, 4  ;;  %p2578_p6 = scmp.ne.s32.totalorder %s3322_s4, %s2577_s22  ;;  %s402_s17 = int_to_ptr.vmem [resolvable:$true] %s401_s17 }
  0x4a   : > { %p2584_p5 = scmp.lt.u32.totalorder %s2577_s22, %s3322_s4 }
  0x4b   : > { %p2580_p10 = pnand %p2578_p6, %p2911_p13 }
  0x4d   : > { %p2581_p3 = pneg %p2580_p10 }
  0x4f   : > { %p2586_p7 = pnand %p2584_p5, %p2581_p3 }
  0x51   : > { %2589 = shalt.err (!%p2586_p7)
}
  0x52   : > { %s2590_s30 = scalar_lea.vmem %s402_s17, 1024  ;;  %p2598_p2 = scmp.lt.s32.totalorder %s402_s17, %s402_s17 }
  0x53   : > { %p2591_p9 = scmp.ne.s32.totalorder %s402_s17, %s2590_s30  ;;  %p2599_p1 = scmp.lt.s32.totalorder %s2590_s30, %s2590_s30 }
  0x55   : > { %p2593_p12 = pnand %p2591_p9, %p2911_p13  ;;  %p2600_p4 = por %p2599_p1, %p2598_p2 }
  0x57   : > { %p2594_p0 = pneg %p2593_p12 }
  0x59   : > { %p2601_p8 = pnand %p2600_p4, %p2594_p0 }
  0x5b   : > { %2604 = shalt.err (!%p2601_p8)
}
  0x5c   : > { %s2746_s24 = smov 64   ;;  %s2747_s15 = smov 4  }
  0x5d   : > { %2316 = dma.hbm_to_vmem [thread:$0]  (!%p2897_p11), %s3322_s4, 1024, %s402_s17, [#allocation11], %s2746_s24, %s2746_s24, %s2747_s15  }
  0x5e   : > { %s2748_s18 = smov [#allocation15]   ;;  %s2605_s29 = scalar_lea.hbm %s3327_s10, 2048 }
  0x5f   : > { %s439_s19 = sshll.u32 %s2748_s18, 4  ;;  %p2606_p4 = scmp.ne.s32.totalorder %s3327_s10, %s2605_s29  ;;  %s440_s19 = int_to_ptr.vmem [resolvable:$true] %s439_s19 }
  0x60   : > { %p2612_p10 = scmp.lt.u32.totalorder %s2605_s29, %s3327_s10 }
  0x61   : > { %p2608_p8 = pnand %p2606_p4, %p2911_p13 }
  0x63   : > { %p2609_p6 = pneg %p2608_p8 }
  0x65   : > { %p2614_p3 = pnand %p2612_p10, %p2609_p6 }
  0x67   : > { %2617 = shalt.err (!%p2614_p3)
}
  0x68   : > { %s2618_s17 = scalar_lea.vmem %s440_s19, 2048  ;;  %p2626_p12 = scmp.lt.s32.totalorder %s440_s19, %s440_s19 }
  0x69   : > { %p2619_p5 = scmp.ne.s32.totalorder %s440_s19, %s2618_s17  ;;  %p2627_p0 = scmp.lt.s32.totalorder %s2618_s17, %s2618_s17 }
  0x6b   : > { %p2621_p7 = pnand %p2619_p5, %p2911_p13  ;;  %p2628_p2 = por %p2627_p0, %p2626_p12 }
  0x6d   : > { %p2622_p9 = pneg %p2621_p7 }
  0x6f   : > { %p2629_p1 = pnand %p2628_p2, %p2622_p9 }
  0x71   : > { %2632 = shalt.err (!%p2629_p1)
}
  0x72   : > { %2322 = dma.hbm_to_vmem [thread:$0]  (!%p2897_p11), %s3327_s10, 2048, %s440_s19, [#allocation14], %s2746_s24, %s2746_s24, %s2747_s15  }
  0x73   : > { %s2995_s20 = sadd.s32 1, %s2737_s12   ;;  %s47_s6 = sadd.s32 1, %s2733_s21 }
  0x74   : > { %s44_s28 = ssub.s32 %s2737_s12, %s2995_s20  ;;  %p54_p13 = scmp.ne.s32.totalorder %s2733_s21, %s2729_s7 }
  0x75   : > { %p45_p4 = scmp.eq.s32.totalorder %s44_s28, 0  ;;  %p55_p8 = scmp.eq.s32.totalorder %s2737_s12, 0 }
  0x76   : > { %p3351_p6 = scmp.eq.s32.totalorder %s2867_s13, 1  ;;  %p2335_p3 = scmp.lt.s32.totalorder %s2737_s12, 2 }
  0x77   : > { %s3011_s18 = scalar_select %p45_p4, %s2733_s21, %s47_s6  }
  0x78   : > { %p3005_p10 = por %p3351_p6, %p54_p13  ;;  %p56_p5 = por %p55_p8, %p54_p13 }
  0x79   : > { %s462_s22 = sand.u32 1, %s2733_s21   ;;  %s2144_s24 = sshll.u32 %s2737_s12, 8 }
  0x7a   : > { %s2051_s26 = sshll.u32 %s462_s22, 4  ;;  %s3018_s29 = scalar_lea.hbm %s3318_s0, %s2144_s24 }
  0x7b   : > { %s466_s27 = scalar_lea.vmem [#allocation7], %s2051_s26  ;;  %p3022_p11 = pnand %p2335_p3, %p56_p5 }
  0x7c   : > { %s473_s30 = sshll.u32 %s466_s27, 4  ;;  %s3026_s2 = scalar_lea.sflag [#allocation8], %s462_s22  ;;  %s3020_s30 = int_to_ptr.vmem [resolvable:$true] %s473_s30 }
  0x7d   : > { %s2633_s16 = scalar_lea.hbm %s3018_s29, 256  ;;  %p2635_p9 = pneg %p3022_p11 }
  0x7e   : > { %p2634_p7 = scmp.ne.s32.totalorder %s3018_s29, %s2633_s16  ;;  %s2638_s26 = scalar_lea.hbm %s3318_s0, 512 }
  0x7f   : > { %p2639_p2 = scmp.lt.u32.totalorder %s3018_s29, %s3318_s0  ;;  %p2640_p1 = scmp.lt.u32.totalorder %s2638_s26, %s2633_s16 }
  0x80   : > { %p2636_p12 = pnand %p2635_p9, %p2634_p7  ;;  %p2642_p4 = scmp.lt.u32.totalorder %s2633_s16, %s3018_s29 }
  0x81   : > { %p2641_p13 = por %p2640_p1, %p2639_p2 }
  0x82   : > { %p2637_p0 = pneg %p2636_p12 }
  0x83   : > { %p2643_p8 = por %p2642_p4, %p2641_p13 }
  0x85   : > { %p2644_p6 = pnand %p2643_p8, %p2637_p0 }
  0x87   : > { %2647 = shalt.err (!%p2644_p6)
}
  0x88   : > { %s2648_s22 = scalar_lea.vmem %s3020_s30, 256  ;;  %s2749_s19 = smov [#allocation7]  }
  0x89   : > { %p2649_p3 = scmp.ne.s32.totalorder %s3020_s30, %s2648_s22  ;;  %s2653_s27 = sshll.u32 %s2749_s19, 4  ;;  %s2654_s27 = int_to_ptr.vmem [resolvable:$false] %s2653_s27 }
  0x8a   : > { %s2655_s6 = scalar_lea.vmem %s2654_s27, 512  ;;  %p2656_p12 = scmp.lt.s32.totalorder %s3020_s30, %s2654_s27 }
  0x8b   : > { %p2651_p5 = pnand %p2649_p3, %p2635_p9  ;;  %p2657_p2 = scmp.lt.s32.totalorder %s2655_s6, %s2648_s22 }
  0x8d   : > { %p2652_p7 = pneg %p2651_p5  ;;  %p2658_p1 = por %p2657_p2, %p2656_p12 }
  0x8f   : > { %p2659_p13 = pnand %p2658_p1, %p2652_p7 }
  0x91   : > { %2662 = shalt.err (!%p2659_p13)
}
  0x92   : > { %s3354_s16 = smov 8   ;;  %s3355_s28 = smov 128  }
  0x93   : > { %2326 = dma.hbm_to_vmem [thread:$0]  (!%p3022_p11), %s3018_s29, 256, %s3020_s30, %s3026_s2, %s3355_s28, %s3355_s28, %s3354_s16  }
  0x94   : > { %p3356_p9 = scmp.ne.s32.totalorder %s3347_s25, 0 }
  0x95   : > { %s3060_s26 = sand.u32 (!%p3356_p9), 1, %s2729_s7   ;;  %p3357_p0 = scmp.ne.s32.totalorder (!%p3356_p9), %s3344_s23, 0 }
  0x96   : > { %485 = sbr.rel (%p3356_p9) target bundleno = 3172 (0xc64), region = 76  ;;  %s2055_s24 = sshll.u32 (!%p3356_p9), %s3060_s26, 4 }
  0x97   : > { %s488_s15 = scalar_lea.sflag (!%p3356_p9), [#allocation8], %s3060_s26  ;;  %s491_s17 = scalar_lea.vmem (!%p3356_p9), [#allocation7], %s2055_s24 }
  0x9d   : > { %2708 = dma.done.wait (%p3357_p0), %s488_s15, 256  }
  0x9e   : > { %2710 = vsyncadd (%p3357_p0), %s488_s15, 4294967040  ;;  %p3358_p11 = scmp.eq.s32.totalorder %s2867_s13, 0 }
  0xa0   : > { %2712 = dma.done.wait (%p3358_p11), [#allocation11], 4096   ;;  %p3359_p4 = pmov %p3358_p11 }
  0xa2   : > { %2714 = vsyncadd (%p3359_p4), [#allocation11], 4294963200  ;;  %p3360_p8 = pmov %p3359_p4 }
  0xa3   : > { %p3361_p6 = pmov %p3359_p4 }
  0xa4   : > { %2716 = dma.done.wait (%p3360_p8), [#allocation14], 4096  }
  0xa5   : > { %2718 = vsyncadd (%p3361_p6), [#allocation14], 4294963200  ;;  %v3078_v4 = vld [vmem:[%s491_s17] sm:$0xff]  ;;  %v3080_v5 = vld [vmem:[%s491_s17 + $0x8] sm:$0xff]  ;;  %v2750_v7 = vmov 0   ;;  %v2751_v20 = vmov 0.0  }
  0xa6   : > { %561 = vadd.xlane.f32.xlu0 %v3078_v4  ;;  %v2061_v6 = vld [vmem:[#allocation3] ss:$0 sm:$0xff]  ;;  %2392 = vset.pattern.permute.xlu1 %v2750_v7  ;;  %v2062_v16 = vld [vmem:[#allocation4] ss:$0 sm:$0xff]  ;;  %v2393_v17 = vld [vmem:[#allocation10 + $0x4] ss:$12 sps:$4 sm:$0xff]  }
  0xa7   : > { %2391 = vset.pattern.permute.xlu0 %v2750_v7  ;;  %830 = vmatprep.mubr.bf16.mxu0 %v2750_v7  ;;  %v2395_v18 = vld [vmem:[#allocation10] ss:$12 sps:$4 sm:$0xff]   ;;  %v2396_v19 = vld [vmem:[#allocation10 + $0x8] ss:$12 sps:$4 sm:$0xff]   ;;  %v2399_v22 = vld [vmem:[#allocation10 + $0x18] ss:$12 sps:$4 sm:$0xff]  }
  0xa8   : > { %798 = vmatprep.subr.bf16.mxu0 %v2393_v17  ;;  %2202 = vmatprep.subr.bf16.mxu1 %v2751_v20  ;;  %v2397_v21 = vld [vmem:[#allocation10 + $0x1c] ss:$12 sps:$4 sm:$0xff]   ;;  %v2400_v23 = vld [vmem:[#allocation10 + $0x20] ss:$12 sps:$4 sm:$0xff]   ;;  %v2404_v26 = vld [vmem:[#allocation10 + $0x38] ss:$12 sps:$4 sm:$0xff]  }
  0xa9   : > { %799 = vmatpush1.bf16.msra.mxu0 %v2395_v18  ;;  %2203 = vmatpush3.bf16.msra.mxu1 %v2396_v19  ;;  %v2401_v24 = vld [vmem:[#allocation10 + $0x34] ss:$12 sps:$4 sm:$0xff]   ;;  %v2403_v25 = vld [vmem:[#allocation10 + $0x30] ss:$12 sps:$4 sm:$0xff]   ;;  %v2405_v27 = vld [vmem:[#allocation10 + $0x4c] ss:$12 sps:$4 sm:$0xff]  }
  0xaa   : > { %563 = vadd.xlane.f32.xlu0 %v3080_v5  ;;  %2204 = vmatprep.subr.bf16.mxu1 %v2751_v20  ;;  %v2407_v28 = vld [vmem:[#allocation10 + $0x48] ss:$12 sps:$4 sm:$0xff]   ;;  %v2408_v29 = vld [vmem:[#allocation10 + $0x50] ss:$12 sps:$4 sm:$0xff]   ;;  %v2411_v31 = vld [vmem:[#allocation10 + $0x60] ss:$12 sps:$4 sm:$0xff]  }
  0xab   : > { %800 = vmatprep.subr.bf16.mxu0 %v2397_v21  ;;  %v2409_v30 = vld [vmem:[#allocation10 + $0x64] ss:$12 sps:$4 sm:$0xff]   ;;  %v2412_v32 = vld [vmem:[#allocation10 + $0x68] ss:$12 sps:$4 sm:$0xff]   ;;  %v2416_v35 = vld [vmem:[#allocation10 + $0x80] ss:$12 sps:$4 sm:$0xff]  }
  0xac   : > { %v2413_v33 = vld [vmem:[#allocation10 + $0x7c] ss:$12 sps:$4 sm:$0xff]   ;;  %v2415_v34 = vld [vmem:[#allocation10 + $0x78] ss:$12 sps:$4 sm:$0xff]   ;;  %v2417_v36 = vld [vmem:[#allocation10 + $0x94] ss:$12 sps:$4 sm:$0xff]  }
  0xad   : > { %801 = vmatpush1.bf16.msra.mxu0 %v2399_v22  ;;  %2205 = vmatpush3.bf16.msra.mxu1 %v2400_v23  ;;  %v2419_v37 = vld [vmem:[#allocation10 + $0x90] ss:$12 sps:$4 sm:$0xff]   ;;  %v2420_v38 = vld [vmem:[#allocation10 + $0x98] ss:$12 sps:$4 sm:$0xff]   ;;  %v2423_v40 = vld [vmem:[#allocation10 + $0xa8] ss:$12 sps:$4 sm:$0xff]  }
  0xae   : > { %2206 = vmatprep.subr.bf16.mxu1 %v2751_v20  ;;  %802 = vmatprep.subr.bf16.mxu0 %v2401_v24  ;;  %v2421_v39 = vld [vmem:[#allocation10 + $0xac] ss:$12 sps:$4 sm:$0xff]   ;;  %v2424_v41 = vld [vmem:[#allocation10 + $0xb0] ss:$12 sps:$4 sm:$0xff]   ;;  %vm2752_vm0 = vmmov 0   ;;  %vm885_vm5 = vcmask 261120  }
  0xaf   : > { %2218 = vmatprep.mubr.msk.bf16.mxu1 %vm2752_vm0, %v2751_v20  ;;  %vm937_vm7 = vcmask 130048   ;;  %s2753_s19 = smov 96   ;;  %s2754_s27 = smov 64   ;;  %vm1140_vm9 = vcmask 523520   ;;  %vm1272_vm10 = vcmask 785920   ;;  %vm1404_vm11 = vcmask 1048320  }
  0xb0   : > { %s2755_s6 = smov 32   ;;  %s551_s29 = scalar_lea.vmem [#allocation16], %s2055_s24 }
  0xb1   : > { %803 = vmatpush1.bf16.msra.mxu0 %v2403_v25  ;;  %2207 = vmatpush3.bf16.msra.mxu1 %v2404_v26  ;;  %s1933_s30 = sshll.u32 %s551_s29, 4  ;;  %s2145_s2 = sshll.u32 %s2867_s13, 8  ;;  %s3268_s30 = int_to_ptr.vmem [resolvable:$true] %s1933_s30 }
  0xb2   : > { %804 = vmatprep.subr.bf16.mxu0 %v2405_v27  ;;  %2208 = vmatprep.subr.bf16.mxu1 %v2751_v20  ;;  %s1920_s24 = scalar_lea.sflag [#allocation9], %s3060_s26  ;;  %s2663_s16 = scalar_lea.vmem %s3268_s30, 256 }
  0xb3   : > { %p2664_p3 = scmp.ne.s32.totalorder %s3268_s30, %s2663_s16  ;;  %s2756_s13 = smov [#allocation16]  }
  0xb4   : > { %s2667_s28 = sshll.u32 %s2756_s13, 4  ;;  %s2668_s28 = int_to_ptr.vmem [resolvable:$false] %s2667_s28 }
  0xb5   : > { %805 = vmatpush1.bf16.msra.mxu0 %v2407_v28  ;;  %2209 = vmatpush3.bf16.msra.mxu1 %v2408_v29  ;;  %p2665_p5 = pnand %p2664_p3, %p3005_p10  ;;  %s2669_s15 = scalar_lea.vmem %s2668_s28, 512 }
  0xb6   : > { %806 = vmatprep.subr.bf16.mxu0 %v2409_v30  ;;  %2210 = vmatprep.subr.bf16.mxu1 %v2751_v20  ;;  %p2670_p12 = scmp.lt.s32.totalorder %s3268_s30, %s2668_s28  ;;  %p2671_p2 = scmp.lt.s32.totalorder %s2669_s15, %s2663_s16 }
  0xb7   : > { %p2666_p7 = pneg %p2665_p5 }
  0xb8   : > { %p2672_p1 = por %p2671_p2, %p2670_p12 }
  0xb9   : > { %807 = vmatpush1.bf16.msra.mxu0 %v2411_v31  ;;  %2211 = vmatpush3.bf16.msra.mxu1 %v2412_v32 }
  0xba   : > { %808 = vmatprep.subr.bf16.mxu0 %v2413_v33  ;;  %2212 = vmatprep.subr.bf16.mxu1 %v2751_v20  ;;  %p2673_p13 = pnand %p2672_p1, %p2666_p7 }
  0xbd   : > { %809 = vmatpush1.bf16.msra.mxu0 %v2415_v34  ;;  %2213 = vmatpush3.bf16.msra.mxu1 %v2416_v35 }
  0xbe   : > { %2214 = vmatprep.subr.bf16.mxu1 %v2751_v20  ;;  %810 = vmatprep.subr.bf16.mxu0 %v2417_v36  ;;  %v3139_v36 = vld [vmem:[%s3319_s1] sm:$0xff] }
  0xbf   : > { %vm557_vm6 = vcmp.eq.f32.partialorder %v3139_v36, 0.0 }
  0xc0   : > { %604 = vperm.xlu0 %2391, %v2061_v6  }
  0xc1   : > { %811 = vmatpush1.bf16.msra.mxu0 %v2419_v37  ;;  %2215 = vmatpush3.bf16.msra.mxu1 %v2420_v38  ;;  %v3144_v37 = vld [vmem:[%s3319_s1 + $0x8] sm:$0xff] }
  0xc2   : > { %2216 = vmatprep.subr.bf16.mxu1 %v2751_v20  ;;  %812 = vmatprep.subr.bf16.mxu0 %v2421_v39  ;;  %vm558_vm8 = vcmp.eq.f32.partialorder %v3144_v37, 0.0 }
  0xc5   : > { %813 = vmatpush1.bf16.msra.mxu0 %v2423_v40  ;;  %2217 = vmatpush3.bf16.msra.mxu1 %v2424_v41 }
  0xc6   : > { %2222 = vmatprep.subr.bf16.mxu1 %v2751_v20  ;;  %2246 = vmatprep.subr.bf16.mxu0 %v2751_v20 }
 0x133   : > { %v562_v8 = vpop.xlane.xlu0 %561 }
 0x134   : > { %v566_v9 = vmul.f32 0.0078125, %v562_v8  ;;  %v655_v8 = vlaneseq }
 0x136   : > { %v3088_v10 = vsub.f32 %v3078_v4, %v566_v9  ;;  %v3115_v9 = vshrl.u32 %v655_v8, 7 }
 0x137   : > { %v564_v11 = vpop.xlane.xlu0 %563 }
 0x138   : > { %v567_v12 = vmul.f32 0.0078125, %v564_v11  ;;  %v570_v13 = vmul.f32 %v3088_v10, %v3088_v10  ;;  %v665_v11 = vsub.s32 2, %v3115_v9 }
 0x13a   : > { %v3093_v14 = vsub.f32 %v3080_v5, %v567_v12  ;;  %572 = vadd.xlane.f32.xlu1 %v570_v13  ;;  %v653_v12 = vld [vmem:[%s3321_s3] sm:$0x7]  ;;  %v661_v13 = vsub.s32 1, %v3115_v9 }
 0x13c   : > { %v571_v15 = vmul.f32 %v3093_v14, %v3093_v14  ;;  %v662_v18 = vrot.slane %v653_v12, %v661_v13 }
 0x13e   : > { %574 = vadd.xlane.f32.xlu1 %v571_v15  ;;  %v666_v15 = vrot.slane %v653_v12, %v665_v11 }
 0x13f   : > { %v605_v60 = vpop.permute.xlu0 %604 }
 0x14f   : > { %615 = vperm.xlu1 %2392, %v2062_v16  }
 0x1c7   : > { %v573_v42 = vpop.xlane.xlu1 %572 }
 0x1c8   : > { %v576_v43 = vmul.f32 0.007874016, %v573_v42 }
 0x1ca   : > { %2473 = vrsqrt.f32 %v576_v43  ;;  %vm580_vm1 = vcmp.eq.f32.partialorder %v576_v43, inf  ;;  %v583_v48 = vand.u32 2147483648, %v576_v43  ;;  %vm582_vm2 = vcmp.eq.f32.partialorder %v576_v43, 0.0 }
 0x1cb   : > { %v575_v44 = vpop.xlane.xlu1 %574 }
 0x1cc   : > { %v577_v45 = vmul.f32 0.007874016, %v575_v44 }
 0x1ce   : > { %2475 = vrsqrt.f32 %v577_v45  ;;  %vm587_vm3 = vcmp.eq.f32.partialorder %v577_v45, inf  ;;  %v590_v54 = vand.u32 2147483648, %v577_v45  ;;  %vm589_vm4 = vcmp.eq.f32.partialorder %v577_v45, 0.0 }
 0x1cf   : > { %v616_v0 = vpop.permute.xlu1 %615 }
 0x1d4   : > { %v2474_v46 = vpop.eup %2473 }
 0x1d5   : > { %v579_v47 = vmul.f32 %v2474_v46, %v576_v43 }
 0x1d7   : > { %v581_v49 = vsel %vm580_vm1, %v576_v43, %v579_v47 }
 0x1d8   : > { %v2476_v50 = vpop.eup %2475  ;;  %v584_v51 = vsel %vm582_vm2, %v583_v48, %v581_v49 }
 0x1d9   : > { %v586_v52 = vmul.f32 %v2476_v50, %v577_v45  ;;  %v592_v53 = vadd.f32 1e-06, %v584_v51 }
 0x1db   : > { %v588_v55 = vsel %vm587_vm3, %v577_v45, %v586_v52  ;;  %2477 = vrcp.f32 %v592_v53 }
 0x1dc   : > { %v591_v56 = vsel %vm589_vm4, %v590_v54, %v588_v55 }
 0x1dd   : > { %v593_v57 = vadd.f32 1e-06, %v591_v56 }
 0x1df   : > { %2479 = vrcp.f32 %v593_v57 }
 0x1e5   : > { %v2478_v58 = vpop.eup %2477 }
 0x1e6   : > { %v596_v59 = vmul.f32 %v2478_v58, %v3088_v10  ;;  %v657_v10 = vsub.s32 0, %v3115_v9 }
 0x1e8   : > { %v607_v63 = vmul.f32 %v605_v60, %v596_v59 }
 0x1e9   : > { %v2480_v61 = vpop.eup %2479 }
 0x1ea   : > { %v597_v62 = vmul.f32 %v2480_v61, %v3093_v14  ;;  %v618_v2 = vadd.f32 %v616_v0, %v607_v63  ;;  %v658_v14 = vrot.slane %v653_v12, %v657_v10 }
 0x1ec   : > { %v608_v1 = vmul.f32 %v605_v60, %v597_v62 }
 0x1ee   : > { %v619_v3 = vadd.f32 %v616_v0, %v608_v1 }
 0x1f0   : > { %v620_v6 = vpack.c.bf16 %v619_v3, %v618_v2 }
 0x1f2   : > { %831 = vmatmul.mubr.bf16.vlgmr.msra.gmra.mrb[0].mxu0 %v620_v6  ;;  %2219 = vmatmul.mubr.bf16.vlgmr.msra.gmra.mrb[0].mxu1 %v620_v6 }
 0x1f3   : > { %2224 = vmatprep.mubr.msk.bf16.mxu1 %vm2752_vm0, %v2751_v20  ;;  %2248 = vmatprep.mubr.msk.bf16.mxu0 %vm2752_vm0, %v2751_v20 }
 0x2c5   : > { %v832_v16 = vpop.f32.mrb[0].mxu0  ;;  %v875_v17 = vpop.f32.mrb[0].mxu1 }
 0x2c6   : > { %v834_v19 = vpop.f32.mrb[1].mxu0  ;;  %v2220_v21 = vpop.f32.mrb[1].mxu1  ;;  %v833_v24 = vadd.f32 %v832_v16, %v658_v14  ;;  %v876_v25 = vadd.f32 %v875_v17, %v666_v15 }
 0x2c7   : > { %v836_v22 = vpop.f32.mrb[2].mxu0  ;;  %v878_v23 = vpop.f32.mrb[2].mxu1  ;;  %v835_v30 = vadd.f32 %v834_v19, %v662_v18 }
 0x2c8   : > { %v837_v26 = vadd.f32 %v836_v22, %v658_v14  ;;  %v879_v27 = vadd.f32 %v878_v23, %v666_v15  ;;  %v838_v28 = vpop.f32.mrb[3].mxu0  ;;  %v2221_v29 = vpop.f32.mrb[3].mxu1 }
 0x2c9   : > { %v839_v31 = vadd.f32 %v838_v28, %v662_v18 }
 0x2ca   : > { %v882_v32 = vpack.c.bf16 %v837_v26, %v833_v24  ;;  %v3127_v33 = vpack.c.bf16 %v879_v27, %v876_v25 }
 0x2cb   : > { %v883_v34 = vpack.c.bf16 %v839_v31, %v835_v30 }
 0x2cd   : > { %v890_v35 = vsel %vm885_vm5, %v883_v34, 0 }
 0x2ce   : > { %2223 = vmatpush3.bf16.xpose.msra.mxu1 %v890_v35 }
 0x2cf   : > { %2228 = vmatprep.subr.bf16.mxu1 %v2751_v20 }
 0x2d5   : > { %2225 = vmatmul.mubr.msk.bf16.vlgmr.msra.gmra.mrb[4].mxu1 %vm885_vm5, %v882_v32 }
 0x2d6   : > { %2229 = vmatpush3.bf16.msra.mxu1 %v3127_v33  ;;  %2230 = vmatprep.mubr.msk.bf16.mxu1 %vm2752_vm0, %v2751_v20 }
 0x2d7   : > { %2234 = vmatprep.subr.bf16.mxu1 %v2751_v20 }
 0x3a8   : > { %v926_v38 = vpop.f32.mrb[4].mxu1 }
 0x3a9   : > { %v933_v39 = vmul.f32 0.17677669, %v926_v38  ;;  %v2226_v40 = vpop.f32.mrb[5].mxu1 }
 0x3aa   : > { %v929_v41 = vpop.f32.mrb[6].mxu1 }
 0x3ab   : > { %v934_v42 = vmul.f32 0.17677669, %v929_v41  ;;  %v2227_v43 = vpop.f32.mrb[7].mxu1  ;;  %v935_v44 = vsel %vm557_vm6, -1e+09, %v933_v39 }
 0x3ac   : > { %v938_v45 = vsel %vm937_vm7, %v935_v44, -inf }
 0x3ad   : > { %939 = vmax.xlane.f32.xlu1 %v938_v45  ;;  %v936_v46 = vsel %vm558_vm8, -1e+09, %v934_v42 }
 0x3ae   : > { %v941_v47 = vsel %vm937_vm7, %v936_v46, -inf }
 0x3af   : > { %942 = vmax.xlane.f32.xlu0 %v941_v47 }
 0x3c5   : > { %1008 = vrot.lane.b32.xlu0 %v882_v32, %s2753_s19 }
 0x43a   : > { %v940_v48 = vpop.xlane.xlu1 %939 }
 0x43b   : > { %v944_v49 = vsub.f32 %v935_v44, %v940_v48 }
 0x43c   : > { %v943_v50 = vpop.xlane.xlu0 %942 }
 0x43d   : > { %v946_v51 = vmul.f32 1.442695, %v944_v49  ;;  %v945_v52 = vsub.f32 %v936_v46, %v943_v50 }
 0x43f   : > { %2481 = vpow2.f32 %v946_v51  ;;  %v948_v53 = vmul.f32 1.442695, %v945_v52 }
 0x440   : > { %v1009_v14 = vpop.permute.xlu0 %1008 }
 0x441   : > { %2483 = vpow2.f32 %v948_v53 }
 0x449   : > { %v2482_v54 = vpop.eup %2481 }
 0x44a   : > { %v950_v55 = vsel %vm937_vm7, %v2482_v54, 0.0 }
 0x44b   : > { %v2484_v56 = vpop.eup %2483  ;;  %951 = vadd.xlane.f32.xlu1 %v950_v55 }
 0x44c   : > { %v953_v57 = vsel %vm937_vm7, %v2484_v56, 0.0 }
 0x44f   : > { %954 = vadd.xlane.f32.xlu1 %v953_v57 }
 0x460   : > { %1011 = vrot.lane.b32.xlu1 %v883_v34, %s2753_s19 }
 0x464   : > { %1144 = vrot.lane.b32.xlu1 %v883_v34, %s2754_s27 }
 0x468   : > { %1142 = vrot.lane.b32.xlu1 %v882_v32, %s2754_s27 }
 0x46c   : > { %1276 = vrot.lane.b32.xlu1 %v883_v34, %s2755_s6 }
 0x470   : > { %1274 = vrot.lane.b32.xlu1 %v882_v32, %s2755_s6 }
 0x4d8   : > { %v952_v58 = vpop.xlane.xlu1 %951 }
 0x4d9   : > { %2485 = vrcp.f32 %v952_v58 }
 0x4dc   : > { %v955_v59 = vpop.xlane.xlu1 %954 }
 0x4dd   : > { %2487 = vrcp.f32 %v955_v59 }
 0x4e0   : > { %v1012_v60 = vpop.permute.xlu1 %1011 }
 0x4e1   : > { %v1017_v8 = vsel %vm885_vm5, %v1012_v60, 0 }
 0x4e3   : > { %v2486_v62 = vpop.eup %2485 }
 0x4e4   : > { %v1145_v61 = vpop.permute.xlu1 %1144  ;;  %v958_v1 = vmul.f32 %v2486_v62, %v2482_v54 }
 0x4e5   : > { %v1150_v63 = vsel %vm885_vm5, %v1145_v61, 0 }
 0x4e6   : > { %2247 = vmatpush3.bf16.xpose.msra.mxu0 %v1150_v63 }
 0x4e7   : > { %v2488_v0 = vpop.eup %2487  ;;  %2258 = vmatprep.subr.bf16.mxu0 %v2751_v20 }
 0x4e8   : > { %v959_v2 = vmul.f32 %v2488_v0, %v2484_v56  ;;  %v1143_v3 = vpop.permute.xlu1 %1142 }
 0x4ea   : > { %v960_v6 = vpack.c.bf16 %v959_v2, %v958_v1 }
 0x4ec   : > { %2231 = vmatmul.mubr.msk.bf16.vlgmr.msra.gmra.mrb[8].mxu1 %vm937_vm7, %v960_v6  ;;  %v1277_v11 = vpop.permute.xlu1 %1276 }
 0x4ed   : > { %2235 = vmatpush3.bf16.xpose.msra.mxu1 %v1017_v8  ;;  %v1282_v12 = vsel %vm885_vm5, %v1277_v11, 0  ;;  %2249 = vmatmul.mubr.msk.bf16.vlgmr.msra.gmra.mrb[4].mxu0 %vm885_vm5, %v1143_v3 }
 0x4ee   : > { %2259 = vmatpush3.bf16.xpose.msra.mxu0 %v1282_v12  ;;  %2236 = vmatprep.mubr.msk.bf16.mxu1 %vm2752_vm0, %v2751_v20 }
 0x4ef   : > { %2260 = vmatprep.mubr.msk.bf16.mxu0 %vm2752_vm0, %v2751_v20  ;;  %2240 = vmatprep.subr.bf16.mxu1 %v2751_v20 }
 0x4f0   : > { %2270 = vmatprep.subr.bf16.mxu0 %v2751_v20  ;;  %v1275_v15 = vpop.permute.xlu1 %1274 }
 0x4f4   : > { %2237 = vmatmul.mubr.msk.bf16.vlgmr.msra.gmra.mrb[12].mxu1 %vm885_vm5, %v1009_v14 }
 0x4f5   : > { %2261 = vmatmul.mubr.msk.bf16.vlgmr.msra.gmra.mrb[8].mxu0 %vm885_vm5, %v1275_v15  ;;  %2242 = vmatprep.mubr.msk.bf16.mxu1 %vm2752_vm0, %v2751_v20 }
 0x4f6   : > { %2286 = vmatprep.mubr.msk.bf16.mxu0 %vm2752_vm0, %v2751_v20 }
 0x5bf   : > { %v998_v16 = vpop.f32.mrb[8].mxu1 }
 0x5c0   : > { %v2232_v17 = vpop.f32.mrb[9].mxu1  ;;  %v1186_v18 = vpop.f32.mrb[4].mxu0 }
 0x5c1   : > { %v1001_v19 = vpop.f32.mrb[10].mxu1  ;;  %v2250_v21 = vpop.f32.mrb[5].mxu0  ;;  %v1193_v31 = vmul.f32 0.17677669, %v1186_v18 }
 0x5c2   : > { %v1005_v22 = vpack.c.bf16 %v1001_v19, %v998_v16  ;;  %v2233_v23 = vpop.f32.mrb[11].mxu1  ;;  %v1189_v24 = vpop.f32.mrb[6].mxu0 }
 0x5c3   : > { %v2251_v25 = vpop.f32.mrb[7].mxu0  ;;  %v1194_v27 = vmul.f32 0.17677669, %v1189_v24  ;;  %v1195_v48 = vsel %vm557_vm6, -1e+09, %v1193_v31 }
 0x5c4   : > { %1006 = vst.msk [vmem:[#allocation2] sm:$0xff] %vm885_vm5, %v1005_v22  ;;  %v1197_v51 = vsel %vm937_vm7, %v1195_v48, -inf }
 0x5c5   : > { %v1196_v45 = vsel %vm558_vm8, -1e+09, %v1194_v27 }
 0x5c6   : > { %v1200_v49 = vsel %vm937_vm7, %v1196_v45, -inf }
 0x5c7   : > { %v1053_v26 = vpop.f32.mrb[12].mxu1 }
 0x5c8   : > { %v1060_v28 = vmul.f32 0.17677669, %v1053_v26  ;;  %v2238_v29 = vpop.f32.mrb[13].mxu1  ;;  %v1318_v30 = vpop.f32.mrb[8].mxu0 }
 0x5c9   : > { %v1056_v32 = vpop.f32.mrb[14].mxu1  ;;  %v2262_v34 = vpop.f32.mrb[9].mxu0  ;;  %v1325_v47 = vmul.f32 0.17677669, %v1318_v30 }
 0x5ca   : > { %v1061_v35 = vmul.f32 0.17677669, %v1056_v32  ;;  %v2239_v38 = vpop.f32.mrb[15].mxu1  ;;  %v1321_v39 = vpop.f32.mrb[10].mxu0  ;;  %v1062_v40 = vsel %vm557_vm6, -1e+09, %v1060_v28 }
 0x5cb   : > { %v2263_v41 = vpop.f32.mrb[11].mxu0  ;;  %v1064_v42 = vsel %vm937_vm7, %v1062_v40, -inf  ;;  %v1326_v43 = vmul.f32 0.17677669, %v1321_v39  ;;  %v1327_v52 = vsel %vm557_vm6, -1e+09, %v1325_v47 }
 0x5cc   : > { %1065 = vmax.xlane.f32.xlu1 %v1064_v42  ;;  %v1063_v44 = vsel %vm558_vm8, -1e+09, %v1061_v35  ;;  %v1329_v54 = vsel %vm937_vm7, %v1327_v52, -inf }
 0x5cd   : > { %v1067_v46 = vsel %vm937_vm7, %v1063_v44, -inf  ;;  %v1328_v50 = vsel %vm558_vm8, -1e+09, %v1326_v43 }
 0x5ce   : > { %1068 = vmax.xlane.f32.xlu0 %v1067_v46  ;;  %v1332_v53 = vsel %vm937_vm7, %v1328_v50, -inf }
 0x5d0   : > { %1201 = vmax.xlane.f32.xlu1 %v1200_v49 }
 0x5d2   : > { %1198 = vmax.xlane.f32.xlu0 %v1197_v51 }
 0x5d4   : > { %1333 = vmax.xlane.f32.xlu1 %v1332_v53  ;;  %v2426_v53 = vld [vmem:[#allocation12 + $0x8] sm:$0xff]  }
 0x5d6   : > { %1330 = vmax.xlane.f32.xlu0 %v1329_v54  ;;  %v2427_v54 = vld [vmem:[#allocation12 + $0x10] sm:$0xff]  }
 0x659   : > { %v1066_v55 = vpop.xlane.xlu1 %1065 }
 0x65a   : > { %v1070_v63 = vsub.f32 %v1062_v40, %v1066_v55  ;;  %v2428_v55 = vld [vmem:[#allocation12 + $0x18] sm:$0xff]  }
 0x65b   : > { %v1069_v56 = vpop.xlane.xlu0 %1068 }
 0x65c   : > { %v1071_v59 = vsub.f32 %v1063_v44, %v1069_v56  ;;  %v1072_v8 = vmul.f32 1.442695, %v1070_v63 }
 0x65d   : > { %v1202_v57 = vpop.xlane.xlu1 %1201 }
 0x65e   : > { %v1204_v58 = vsub.f32 %v1196_v45, %v1202_v57  ;;  %v1074_v1 = vmul.f32 1.442695, %v1071_v59  ;;  %v2429_v57 = vld [vmem:[#allocation12 + $0x20] sm:$0xff]   ;;  %v2430_v59 = vld [vmem:[#allocation12 + $0x28] sm:$0xff]  }
 0x65f   : > { %v1199_v60 = vpop.xlane.xlu0 %1198 }
 0x660   : > { %v1207_v37 = vmul.f32 1.442695, %v1204_v58  ;;  %v1203_v61 = vsub.f32 %v1195_v48, %v1199_v60 }
 0x661   : > { %v1334_v62 = vpop.xlane.xlu1 %1333 }
 0x662   : > { %2489 = vpow2.f32 %v1207_v37  ;;  %v1205_v0 = vmul.f32 1.442695, %v1203_v61  ;;  %v1336_v36 = vsub.f32 %v1328_v50, %v1334_v62  ;;  %v2431_v62 = vld [vmem:[#allocation12 + $0x30] sm:$0xff]  }
 0x663   : > { %v1331_v2 = vpop.xlane.xlu0 %1330 }
 0x664   : > { %2491 = vpow2.f32 %v1205_v0  ;;  %v1339_v3 = vmul.f32 1.442695, %v1336_v36  ;;  %v1335_v6 = vsub.f32 %v1327_v52, %v1331_v2  ;;  %v2425_v52 = vld [vmem:[#allocation12] sm:$0xff]   ;;  %v2432_v36 = vld [vmem:[#allocation12 + $0x38] sm:$0xff]  }
 0x665   : > { %2271 = vmatpush3.bf16.msra.mxu0 %v2425_v52  ;;  %v2454_v52 = vld [vmem:[#allocation13 + $0x70] ss:$8 sps:$4 sm:$0xff]  }
 0x666   : > { %2493 = vpow2.f32 %v1339_v3  ;;  %v1337_v11 = vmul.f32 1.442695, %v1335_v6  ;;  %2272 = vmatprep.subr.bf16.mxu0 %v2751_v20 }
 0x667   : > { %2495 = vpow2.f32 %v1074_v1 }
 0x668   : > { %2497 = vpow2.f32 %v1337_v11 }
 0x669   : > { %2499 = vpow2.f32 %v1072_v8  ;;  %2273 = vmatpush3.bf16.msra.mxu0 %v2426_v53  ;;  %v2457_v53 = vld [vmem:[#allocation15 + $0x40] sm:$0xff]  }
 0x66a   : > { %2274 = vmatprep.subr.bf16.mxu0 %v2751_v20 }
 0x66c   : > { %v2490_v12 = vpop.eup %2489 }
 0x66d   : > { %v1212_v14 = vsel %vm937_vm7, %v2490_v12, 0.0  ;;  %2275 = vmatpush3.bf16.msra.mxu0 %v2427_v54  ;;  %v2458_v54 = vld [vmem:[#allocation15] sm:$0xff]  }
 0x66e   : > { %v2492_v15 = vpop.eup %2491  ;;  %1213 = vadd.xlane.f32.xlu1 %v1212_v14  ;;  %2276 = vmatprep.subr.bf16.mxu0 %v2751_v20 }
 0x66f   : > { %v1209_v16 = vsel %vm937_vm7, %v2492_v15, 0.0 }
 0x670   : > { %v2494_v17 = vpop.eup %2493  ;;  %1210 = vadd.xlane.f32.xlu0 %v1209_v16 }
 0x671   : > { %v2496_v18 = vpop.eup %2495  ;;  %v1344_v19 = vsel %vm937_vm7, %v2494_v17, 0.0  ;;  %2277 = vmatpush3.bf16.msra.mxu0 %v2428_v55  ;;  %v2459_v55 = vld [vmem:[#allocation15 + $0x48] sm:$0xff]  }
 0x672   : > { %v2498_v21 = vpop.eup %2497  ;;  %1345 = vadd.xlane.f32.xlu1 %v1344_v19  ;;  %v1079_v24 = vsel %vm937_vm7, %v2496_v18, 0.0  ;;  %2278 = vmatprep.subr.bf16.mxu0 %v2751_v20 }
 0x673   : > { %v1341_v22 = vsel %vm937_vm7, %v2498_v21, 0.0  ;;  %v2500_v23 = vpop.eup %2499 }
 0x674   : > { %1342 = vadd.xlane.f32.xlu0 %v1341_v22  ;;  %v1076_v25 = vsel %vm937_vm7, %v2500_v23, 0.0 }
 0x675   : > { %2279 = vmatpush3.bf16.msra.mxu0 %v2429_v57  ;;  %v2461_v57 = vld [vmem:[#allocation15 + $0x50] sm:$0xff]  }
 0x676   : > { %1080 = vadd.xlane.f32.xlu1 %v1079_v24  ;;  %2280 = vmatprep.subr.bf16.mxu0 %v2751_v20 }
 0x678   : > { %1077 = vadd.xlane.f32.xlu0 %v1076_v25 }
 0x679   : > { %2281 = vmatpush3.bf16.msra.mxu0 %v2430_v59  ;;  %v2464_v59 = vld [vmem:[#allocation15 + $0x18] sm:$0xff]  }
 0x67a   : > { %2282 = vmatprep.subr.bf16.mxu0 %v2751_v20 }
 0x67d   : > { %2283 = vmatpush3.bf16.msra.mxu0 %v2431_v62 }
 0x67e   : > { %2284 = vmatprep.subr.bf16.mxu0 %v2751_v20 }
 0x681   : > { %2285 = vmatpush3.bf16.msra.mxu0 %v2432_v36 }
 0x682   : > { %2180 = vmatprep.subr.bf16.mxu0 %v2457_v53 }
 0x687   : > { %1220 = vrot.lane.b32.xlu1 %v3127_v33, %s2754_s27 }
 0x68b   : > { %1352 = vrot.lane.b32.xlu1 %v3127_v33, %s2755_s6 }
 0x68e   : > { %1088 = vrot.lane.b32.xlu0 %v3127_v33, %s2753_s19 }
 0x6fb   : > { %v1214_v26 = vpop.xlane.xlu1 %1213 }
 0x6fd   : > { %v1211_v27 = vpop.xlane.xlu0 %1210 }
 0x6ff   : > { %v1346_v28 = vpop.xlane.xlu1 %1345 }
 0x701   : > { %v1343_v29 = vpop.xlane.xlu0 %1342 }
 0x703   : > { %v1081_v30 = vpop.xlane.xlu1 %1080 }
 0x704   : > { %2501 = vrcp.f32 %v1081_v30 }
 0x705   : > { %v1078_v31 = vpop.xlane.xlu0 %1077 }
 0x706   : > { %2503 = vrcp.f32 %v1078_v31 }
 0x707   : > { %2505 = vrcp.f32 %v1211_v27  ;;  %v1221_v41 = vpop.permute.xlu1 %1220 }
 0x708   : > { %2507 = vrcp.f32 %v1214_v26 }
 0x709   : > { %v1089_v32 = vpop.permute.xlu0 %1088  ;;  %2509 = vrcp.f32 %v1343_v29 }
 0x70a   : > { %2241 = vmatpush3.bf16.msra.mxu1 %v1089_v32  ;;  %2511 = vrcp.f32 %v1346_v28 }
 0x70b   : > { %2252 = vmatprep.subr.bf16.mxu1 %v2751_v20  ;;  %v1353_v47 = vpop.permute.xlu1 %1352 }
 0x70e   : > { %v2502_v34 = vpop.eup %2501 }
 0x70f   : > { %v1085_v38 = vmul.f32 %v2502_v34, %v2496_v18  ;;  %v2105_v34 = vld [vmem:[#allocation6] ss:$0 sm:$0xff] }
 0x710   : > { %v2504_v35 = vpop.eup %2503 }
 0x711   : > { %v1084_v39 = vmul.f32 %v2504_v35, %v2500_v23  ;;  %v2506_v40 = vpop.eup %2505  ;;  %v2104_v35 = vld [vmem:[#allocation5] ss:$0 sm:$0xff] }
 0x712   : > { %v2508_v42 = vpop.eup %2507  ;;  %v1217_v43 = vmul.f32 %v2506_v40, %v2492_v15  ;;  %v2436_v40 = vld [vmem:[#allocation13 + $0x10] ss:$8 sps:$4 sm:$0xff]  }
 0x713   : > { %v1086_v33 = vpack.c.bf16 %v1085_v38, %v1084_v39  ;;  %v1218_v44 = vmul.f32 %v2508_v42, %v2490_v12  ;;  %v2510_v46 = vpop.eup %2509  ;;  %v2435_v38 = vld [vmem:[#allocation13 + $0x4] ss:$8 sps:$4 sm:$0xff]   ;;  %v2433_v39 = vld [vmem:[#allocation13] ss:$8 sps:$4 sm:$0xff]  }
 0x714   : > { %v2512_v48 = vpop.eup %2511  ;;  %v1349_v49 = vmul.f32 %v2510_v46, %v2498_v21  ;;  %v2439_v42 = vld [vmem:[#allocation13 + $0x20] ss:$8 sps:$4 sm:$0xff]  }
 0x715   : > { %2243 = vmatmul.mubr.msk.bf16.vlgmr.msra.gmra.mrb[16].mxu1 %vm937_vm7, %v1086_v33  ;;  %v1219_v45 = vpack.c.bf16 %v1218_v44, %v1217_v43  ;;  %v1350_v50 = vmul.f32 %v2512_v48, %v2494_v17  ;;  %v2095_v17 = vld [vmem:[%s3323_s5] ss:$0 sm:$0xff]  ;;  %v2442_v44 = vld [vmem:[#allocation13 + $0x30] ss:$8 sps:$4 sm:$0xff]   ;;  %v2445_v46 = vld [vmem:[#allocation13 + $0x40] ss:$8 sps:$4 sm:$0xff]  }
 0x716   : > { %2253 = vmatpush3.bf16.msra.mxu1 %v1221_v41  ;;  %2254 = vmatprep.mubr.msk.bf16.mxu1 %vm2752_vm0, %v2751_v20  ;;  %v2438_v33 = vld [vmem:[#allocation13 + $0x14] ss:$8 sps:$4 sm:$0xff]   ;;  %v2441_v41 = vld [vmem:[#allocation13 + $0x24] ss:$8 sps:$4 sm:$0xff]   ;;  %v2448_v48 = vld [vmem:[#allocation13 + $0x50] ss:$8 sps:$4 sm:$0xff]  }
 0x717   : > { %2264 = vmatprep.subr.bf16.mxu1 %v2751_v20  ;;  %v1351_v51 = vpack.c.bf16 %v1350_v50, %v1349_v49  ;;  %v2444_v43 = vld [vmem:[#allocation13 + $0x34] ss:$8 sps:$4 sm:$0xff]   ;;  %v2453_v49 = vld [vmem:[#allocation13 + $0x64] ss:$8 sps:$4 sm:$0xff]   ;;  %v2451_v50 = vld [vmem:[#allocation13 + $0x60] ss:$8 sps:$4 sm:$0xff]  }
 0x71d   : > { %2255 = vmatmul.mubr.msk.bf16.vlgmr.msra.gmra.mrb[20].mxu1 %vm937_vm7, %v1219_v45  ;;  %v2447_v45 = vld [vmem:[#allocation13 + $0x44] ss:$8 sps:$4 sm:$0xff]  }
 0x71e   : > { %2265 = vmatpush3.bf16.msra.mxu1 %v1353_v47  ;;  %2266 = vmatprep.mubr.msk.bf16.mxu1 %vm2752_vm0, %v2751_v20  ;;  %v2450_v47 = vld [vmem:[#allocation13 + $0x54] ss:$8 sps:$4 sm:$0xff]  }
 0x71f   : > { %1690 = vmatprep.subr.bf16.mxu1 %v2435_v38  ;;  %v2471_v38 = vld [vmem:[#allocation15 + $0x78] sm:$0xff]  }
 0x725   : > { %2267 = vmatmul.mubr.msk.bf16.vlgmr.msra.gmra.mrb[24].mxu1 %vm937_vm7, %v1351_v51  ;;  %v2456_v51 = vld [vmem:[#allocation13 + $0x74] ss:$8 sps:$4 sm:$0xff]  }
 0x726   : > { %1722 = vmatprep.mubr.bf16.mxu1 %v2750_v7  ;;  %1691 = vmatpush1.bf16.msra.mxu1 %v2433_v39  ;;  %v2472_v39 = vld [vmem:[#allocation15 + $0x38] sm:$0xff]  }
 0x727   : > { %1692 = vmatprep.subr.bf16.mxu1 %v2438_v33 }
 0x72a   : > { %1693 = vmatpush1.bf16.msra.mxu1 %v2436_v40 }
 0x72b   : > { %1694 = vmatprep.subr.bf16.mxu1 %v2441_v41 }
 0x72e   : > { %1695 = vmatpush1.bf16.msra.mxu1 %v2439_v42 }
 0x72f   : > { %1696 = vmatprep.subr.bf16.mxu1 %v2444_v43 }
 0x732   : > { %1697 = vmatpush1.bf16.msra.mxu1 %v2442_v44 }
 0x733   : > { %1698 = vmatprep.subr.bf16.mxu1 %v2447_v45 }
 0x736   : > { %1699 = vmatpush1.bf16.msra.mxu1 %v2445_v46 }
 0x737   : > { %1700 = vmatprep.subr.bf16.mxu1 %v2450_v47 }
 0x73a   : > { %1701 = vmatpush1.bf16.msra.mxu1 %v2448_v48 }
 0x73b   : > { %1702 = vmatprep.subr.bf16.mxu1 %v2453_v49 }
 0x73e   : > { %1703 = vmatpush1.bf16.msra.mxu1 %v2451_v50 }
 0x73f   : > { %1704 = vmatprep.subr.bf16.mxu1 %v2456_v51 }
 0x742   : > { %1705 = vmatpush1.bf16.msra.mxu1 %v2454_v52 }
 0x7e8   : > { %v1128_v56 = vpop.f32.mrb[16].mxu1 }
 0x7e9   : > { %v2244_v58 = vpop.f32.mrb[17].mxu1 }
 0x7ea   : > { %v1131_v7 = vpop.f32.mrb[18].mxu1  ;;  %v2462_v58 = vld [vmem:[#allocation15 + $0x10] sm:$0xff]  }
 0x7eb   : > { %v1135_v60 = vpack.c.bf16 %v1131_v7, %v1128_v56  ;;  %v2245_v37 = vpop.f32.mrb[19].mxu1  ;;  %v2460_v56 = vld [vmem:[#allocation15 + $0x8] sm:$0xff]   ;;  %v2463_v7 = vld [vmem:[#allocation15 + $0x58] sm:$0xff]  }
 0x7ec   : > { %v2466_v37 = vld [vmem:[#allocation15 + $0x20] sm:$0xff]  }
 0x7ed   : > { %1137 = vrot.lane.b32.xlu0 %v1135_v60, %s2755_s6  ;;  %v2465_v60 = vld [vmem:[#allocation15 + $0x60] sm:$0xff]  }
 0x7f0   : > { %v1260_v61 = vpop.f32.mrb[20].mxu1 }
 0x7f1   : > { %v2256_v63 = vpop.f32.mrb[21].mxu1 }
 0x7f2   : > { %v1263_v0 = vpop.f32.mrb[22].mxu1 }
 0x7f3   : > { %v1267_v1 = vpack.c.bf16 %v1263_v0, %v1260_v61  ;;  %v2257_v2 = vpop.f32.mrb[23].mxu1  ;;  %v2467_v61 = vld [vmem:[#allocation15 + $0x68] sm:$0xff]  }
 0x7f5   : > { %1269 = vrot.lane.b32.xlu1 %v1267_v1, %s2754_s27  ;;  %s3362_s27 = sld [smem:[#allocation24_spill]] }
 0x7f8   : > { %v1392_v3 = vpop.f32.mrb[24].mxu1 }
 0x7f9   : > { %v2268_v6 = vpop.f32.mrb[25].mxu1 }
 0x7fa   : > { %v1395_v8 = vpop.f32.mrb[26].mxu1 }
 0x7fb   : > { %v1399_v11 = vpack.c.bf16 %v1395_v8, %v1392_v3  ;;  %v2269_v12 = vpop.f32.mrb[27].mxu1  ;;  %s3273_s6 = scalar_lea.hbm %s3362_s27, %s2145_s2 }
 0x7fd   : > { %1401 = vrot.lane.b32.xlu0 %v1399_v11, %s2753_s19 }
 0x85f   : > { %v1138_v14 = vpop.permute.xlu0 %1137 }
 0x860   : > { %1141 = vst.msk [vmem:[#allocation2] sm:$0xff] %vm1140_vm9, %v1138_v14 }
 0x867   : > { %v1270_v15 = vpop.permute.xlu1 %1269 }
 0x868   : > { %1273 = vst.msk [vmem:[#allocation2] sm:$0xff] %vm1272_vm10, %v1270_v15 }
 0x86f   : > { %v1402_v16 = vpop.permute.xlu0 %1401 }
 0x870   : > { %1405 = vst.msk [vmem:[#allocation2] sm:$0xff] %vm1404_vm11, %v1402_v16 }
 0x877   : > { %v1406_v20 = vld [vmem:[#allocation2] sm:$0xff] }
 0x878   : > { %2287 = vmatmul.mubr.bf16.vlgmr.msra.gmra.mrb[12].mxu0 %v1406_v20 }
 0x879   : > { %2181 = vmatpush3.bf16.msra.mxu0 %v2458_v54 }
 0x87a   : > { %2182 = vmatprep.subr.bf16.mxu0 %v2459_v55 }
 0x87d   : > { %2183 = vmatpush3.bf16.msra.mxu0 %v2460_v56 }
 0x87e   : > { %2184 = vmatprep.subr.bf16.mxu0 %v2461_v57 }
 0x881   : > { %2185 = vmatpush3.bf16.msra.mxu0 %v2462_v58 }
 0x882   : > { %2186 = vmatprep.subr.bf16.mxu0 %v2463_v7 }
 0x885   : > { %2187 = vmatpush3.bf16.msra.mxu0 %v2464_v59 }
 0x886   : > { %2188 = vmatprep.subr.bf16.mxu0 %v2465_v60 }
 0x889   : > { %2189 = vmatpush3.bf16.msra.mxu0 %v2466_v37 }
 0x88a   : > { %2190 = vmatprep.subr.bf16.mxu0 %v2467_v61 }
 0x94b   : > { %v1512_v18 = vpop.f32.mrb[12].mxu0 }
 0x94c   : > { %v1513_v19 = vadd.f32 %v2095_v17, %v1512_v18  ;;  %v2288_v21 = vpop.f32.mrb[13].mxu0 }
 0x94d   : > { %v1515_v22 = vpop.f32.mrb[14].mxu0 }
 0x94e   : > { %v3235_v23 = vadd.f32 %v1513_v19, %v3078_v4  ;;  %v1516_v24 = vadd.f32 %v2095_v17, %v1515_v22  ;;  %v2289_v25 = vpop.f32.mrb[15].mxu0 }
 0x950   : > { %v3238_v26 = vadd.f32 %v1516_v24, %v3080_v5  ;;  %1523 = vadd.xlane.f32.xlu1 %v3235_v23 }
 0x952   : > { %1525 = vadd.xlane.f32.xlu0 %v3238_v26 }
 0x9dd   : > { %v1524_v27 = vpop.xlane.xlu1 %1523 }
 0x9de   : > { %v1527_v28 = vmul.f32 0.0078125, %v1524_v27 }
 0x9df   : > { %v1526_v29 = vpop.xlane.xlu0 %1525 }
 0x9e0   : > { %v3243_v30 = vsub.f32 %v3235_v23, %v1527_v28  ;;  %v1528_v31 = vmul.f32 0.0078125, %v1526_v29 }
 0x9e2   : > { %v3246_v32 = vsub.f32 %v3238_v26, %v1528_v31  ;;  %v1531_v4 = vmul.f32 %v3243_v30, %v3243_v30 }
 0x9e4   : > { %1533 = vadd.xlane.f32.xlu0 %v1531_v4  ;;  %v1532_v5 = vmul.f32 %v3246_v32, %v3246_v32 }
 0x9e6   : > { %1535 = vadd.xlane.f32.xlu1 %v1532_v5  ;;  %v2468_v5 = vld [vmem:[#allocation15 + $0x28] sm:$0xff]  }
 0x9e7   : > { %2191 = vmatpush3.bf16.msra.mxu0 %v2468_v5 }
 0x9f7   : > { %1576 = vperm.xlu1 %2392, %v2105_v34   ;;  %v2469_v34 = vld [vmem:[#allocation15 + $0x70] sm:$0xff]  }
 0x9f8   : > { %2192 = vmatprep.subr.bf16.mxu0 %v2469_v34 }
 0x9fa   : > { %1565 = vperm.xlu0 %2391, %v2104_v35   ;;  %v2470_v35 = vld [vmem:[#allocation15 + $0x30] sm:$0xff]  }
 0x9fb   : > { %2193 = vmatpush3.bf16.msra.mxu0 %v2470_v35 }
 0x9fc   : > { %2194 = vmatprep.subr.bf16.mxu0 %v2471_v38 }
 0x9ff   : > { %2195 = vmatpush3.bf16.msra.mxu0 %v2472_v39 }
 0xa71   : > { %v1534_v62 = vpop.xlane.xlu0 %1533 }
 0xa72   : > { %v1537_v63 = vmul.f32 0.007874016, %v1534_v62 }
 0xa73   : > { %v1536_v0 = vpop.xlane.xlu1 %1535 }
 0xa74   : > { %2513 = vrsqrt.f32 %v1537_v63  ;;  %v1538_v36 = vmul.f32 0.007874016, %v1536_v0  ;;  %vm1541_vm12 = vcmp.eq.f32.partialorder %v1537_v63, inf  ;;  %v1544_v6 = vand.u32 2147483648, %v1537_v63 }
 0xa75   : > { %vm1543_vm13 = vcmp.eq.f32.partialorder %v1537_v63, 0.0 }
 0xa76   : > { %2515 = vrsqrt.f32 %v1538_v36  ;;  %vm1548_vm14 = vcmp.eq.f32.partialorder %v1538_v36, inf  ;;  %v1551_v12 = vand.u32 2147483648, %v1538_v36  ;;  %vm1550_vm15 = vcmp.eq.f32.partialorder %v1538_v36, 0.0 }
 0xa77   : > { %v1577_v28 = vpop.permute.xlu1 %1576 }
 0xa79   : > { %v1566_v22 = vpop.permute.xlu0 %1565 }
 0xa7e   : > { %v2514_v1 = vpop.eup %2513 }
 0xa7f   : > { %v1540_v2 = vmul.f32 %v2514_v1, %v1537_v63 }
 0xa80   : > { %v2516_v3 = vpop.eup %2515 }
 0xa81   : > { %v1547_v8 = vmul.f32 %v2516_v3, %v1538_v36  ;;  %v1542_v11 = vsel %vm1541_vm12, %v1537_v63, %v1540_v2 }
 0xa82   : > { %v1545_v14 = vsel %vm1543_vm13, %v1544_v6, %v1542_v11 }
 0xa83   : > { %v1549_v15 = vsel %vm1548_vm14, %v1538_v36, %v1547_v8  ;;  %v1553_v16 = vadd.f32 1e-06, %v1545_v14 }
 0xa84   : > { %v1552_v20 = vsel %vm1550_vm15, %v1551_v12, %v1549_v15 }
 0xa85   : > { %v1554_v17 = vadd.f32 1e-06, %v1552_v20  ;;  %2517 = vrcp.f32 %v1553_v16 }
 0xa87   : > { %2519 = vrcp.f32 %v1554_v17 }
 0xa8f   : > { %v2518_v18 = vpop.eup %2517 }
 0xa90   : > { %v1557_v19 = vmul.f32 %v2518_v18, %v3243_v30  ;;  %v1598_v30 = vld [vmem:[%s3326_s9] sm:$0x3] }
 0xa91   : > { %v2520_v21 = vpop.eup %2519  ;;  %v1607_v33 = vrot.slane %v1598_v30, %v661_v13 }
 0xa92   : > { %v1558_v24 = vmul.f32 %v2520_v21, %v3246_v32  ;;  %v1568_v25 = vmul.f32 %v1566_v22, %v1557_v19  ;;  %v1603_v32 = vrot.slane %v1598_v30, %v657_v10  ;;  %v2122_v10 = vld [vmem:[%s3328_s11] ss:$0 sm:$0xff] }
 0xa94   : > { %v1569_v27 = vmul.f32 %v1566_v22, %v1558_v24  ;;  %v1579_v29 = vadd.f32 %v1577_v28, %v1568_v25 }
 0xa96   : > { %v1580_v31 = vadd.f32 %v1577_v28, %v1569_v27 }
 0xa98   : > { %v1581_v4 = vpack.c.bf16 %v1580_v31, %v1579_v29 }
 0xa9a   : > { %1723 = vmatmul.mubr.bf16.vlgmr.msra.gmra.mrb[28].mxu1 %v1581_v4 }
 0xb6d   : > { %v1724_v40 = vpop.f32.mrb[28].mxu1 }
 0xb6e   : > { %v1725_v41 = vadd.f32 %v1724_v40, %v1603_v32  ;;  %v1726_v42 = vpop.f32.mrb[29].mxu1 }
 0xb6f   : > { %v1727_v43 = vadd.f32 %v1726_v42, %v1607_v33  ;;  %v1728_v44 = vpop.f32.mrb[30].mxu1 }
 0xb70   : > { %v1729_v45 = vadd.f32 %v1728_v44, %v1603_v32  ;;  %v1730_v46 = vpop.f32.mrb[31].mxu1  ;;  %v1733_v48 = vmax.f32 %v1725_v41, 0.0 }
 0xb71   : > { %v1731_v47 = vadd.f32 %v1730_v46, %v1607_v33  ;;  %v1734_v50 = vmax.f32 %v1727_v43, 0.0 }
 0xb72   : > { %v1735_v49 = vmax.f32 %v1729_v45, 0.0 }
 0xb73   : > { %v1736_v51 = vmax.f32 %v1731_v47, 0.0 }
 0xb74   : > { %v1737_v52 = vpack.c.bf16 %v1735_v49, %v1733_v48 }
 0xb75   : > { %v1738_v53 = vpack.c.bf16 %v1736_v51, %v1734_v50 }
 0xb77   : > { %1906 = vmatprep.mubr.bf16.mxu0 %v1738_v53 }
 0xb78   : > { %1907 = vmatmul.mubr.bf16.vlgmr.msra.gmra.mrb[16].mxu0 %v1737_v52 }
 0xc4b   : > { %v2196_v9 = vpop.f32.mrb[16].mxu0 }
 0xc4c   : > { %v2197_v13 = vpop.f32.mrb[17].mxu0 }
 0xc4d   : > { %v2198_v54 = vadd.f32 %v2197_v13, %v2196_v9  ;;  %v2199_v55 = vpop.f32.mrb[18].mxu0 }
 0xc4e   : > { %v2200_v56 = vpop.f32.mrb[19].mxu0 }
 0xc4f   : > { %v1909_v57 = vadd.f32 %v2198_v54, %v2122_v10  ;;  %v2201_v58 = vadd.f32 %v2200_v56, %v2199_v55 }
 0xc51   : > { %v1915_v7 = vadd.f32 %v1909_v57, %v3235_v23  ;;  %v1912_v59 = vadd.f32 %v2201_v58, %v2122_v10 }
 0xc53   : > { %1917 = vst [vmem:[%s551_s29] sm:$0xff] %v1915_v7  ;;  %v1916_v60 = vadd.f32 %v1912_v59, %v3238_v26 }
 0xc55   : > { %1918 = vst [vmem:[%s551_s29 + $0x8] sm:$0xff] %v1916_v60 }
 0xc56   : > { %2676 = shalt.err (!%p2673_p13)
}
 0xc57   : > { %s2677_s17 = scalar_lea.hbm %s3273_s6, 256  ;;  %s2681_s29 = scalar_lea.hbm %s3362_s27, 512 }
 0xc58   : > { %p2678_p9 = scmp.ne.s32.totalorder %s3273_s6, %s2677_s17  ;;  %p2682_p4 = scmp.lt.u32.totalorder %s3273_s6, %s3362_s27 }
 0xc59   : > { %p2683_p8 = scmp.lt.u32.totalorder %s2681_s29, %s2677_s17  ;;  %p2685_p3 = scmp.lt.u32.totalorder %s2677_s17, %s3273_s6 }
 0xc5a   : > { %p2679_p0 = pnand %p2678_p9, %p3005_p10 }
 0xc5b   : > { %p2684_p6 = por %p2683_p8, %p2682_p4 }
 0xc5c   : > { %p2680_p11 = pneg %p2679_p0 }
 0xc5d   : > { %p2686_p5 = por %p2685_p3, %p2684_p6 }
 0xc5f   : > { %p2687_p7 = pnand %p2686_p5, %p2680_p11 }
 0xc61   : > { %2690 = shalt.err (!%p2687_p7)
}
 0xc62   : > { %s2757_s19 = smov 128   ;;  %s2758_s16 = smov 8  }
 0xc63   : > { %2308 = dma.vmem_to_hbm [thread:$0]  (%p3005_p10), %s3268_s30, 256, %s3273_s6, %s1920_s24, %s2757_s19, %s2757_s19, %s2758_s16  }
 0xc64 PF: > { %s3363_s13 = sld [smem:[#allocation21_spill]]  ;;  %s3364_s28 = sld [smem:[#allocation22_spill]] }
 0xc65   : > { %p3366_p2 = scmp.ge.s32.totalorder %s2737_s12, 2 }
 0xc6a   : > { %s1948_s15 = sand.u32 1, %s3363_s13   ;;  %p3365_p12 = scmp.ne.s32.totalorder %s3364_s28, 0 }
 0xc6b   : > { %s1949_s17 = scalar_lea.sflag [#allocation9], %s1948_s15 }
 0xc6c   : > { %p2328_p1 = pnand %p3366_p2, %p3365_p12 }
 0xc6e   : > { %2720 = dma.done.wait (!%p2328_p1), %s1949_s17, 256  }
 0xc6f   : > { %2722 = vsyncadd (!%p2328_p1), %s1949_s17, 4294967040  ;;  %p37_p13 = scmp.ge.s32.totalorder %s2995_s20, 4   ;;  %s3367_s6 = smov %s2729_s7 }
 0xc70   : > { %s3368_s7 = smov %s2733_s21  ;;  %s3369_s21 = smov %s3011_s18 }
 0xc71   : > { %s3370_s12 = smov %s2995_s20  ;;  %39 = sbr.rel (!%p37_p13) target bundleno = 11 (0xb), region = 137 }
 0xc78   :  { %1954 = vsyncpa [#allocation8], 1 }
 0xc79   :  { %1956 = vsyncpa [#allocation8 + $0x1], 1 }
 0xc7a   :  { %1957 = vsyncpa [#allocation11], 1 }
 0xc7b   :  { %1958 = vsyncpa [#allocation14], 1 }
 0xc7c   :  { %1959 = vsyncpa [#allocation9], 1 }
 0xc7d   :  { %1961 = vsyncpa [#allocation9 + $0x1], 1 }

</bundles_post_ra>
